<compile_context>
chip_gen: v7x
topology: tpu7x:2x2x1
jax: 0.10.0
libtpu: 0.0.40
codegen_flags: <defaults>
</compile_context>

<pallas_src>
import jax
import jax.numpy as jnp
from jax import lax
from jax.experimental import pallas as pl
from jax.experimental.pallas import tpu as pltpu


# (dy, dx) offsets for a 3x3 kernel; flat tap index t == (dy+1)*3 + (dx+1),
# matching PyTorch's (kh, kw) weight layout.
_TAPS = tuple((dy, dx) for dy in (-1, 0, 1) for dx in (-1, 0, 1))


def _bilinear_matrix(out_size, in_size):
    """PyTorch bilinear (align_corners=False) interpolation matrix (out, in)."""
    if out_size == in_size:
        return jnp.eye(out_size, dtype=jnp.float32)
    ratio = in_size / out_size
    dst = jnp.arange(out_size, dtype=jnp.float32)
    src = jnp.maximum(ratio * (dst + 0.5) - 0.5, 0.0)
    i0 = jnp.floor(src).astype(jnp.int32)
    i1 = jnp.minimum(i0 + 1, in_size - 1)
    lam1 = src - i0.astype(jnp.float32)
    lam0 = 1.0 - lam1
    rows = jnp.arange(out_size)
    m = jnp.zeros((out_size, in_size), jnp.float32)
    m = m.at[rows, i0].add(lam0)
    m = m.at[rows, i1].add(lam1)
    return m


def _tap_masks(h, w):
    """(9, h*w) float masks: mask[t, f] == 1 where tap t reads in-bounds."""
    hh = jnp.arange(h, dtype=jnp.int32)[:, None]
    ww = jnp.arange(w, dtype=jnp.int32)[None, :]
    rows = []
    for dy, dx in _TAPS:
        ok = ((hh + dy >= 0) & (hh + dy < h) & (ww + dx >= 0) & (ww + dx < w))
        rows.append(ok.astype(jnp.float32).reshape(-1))
    return jnp.stack(rows, axis=0)


# ----------------------------------------------------------------------------
# Forward wrapper (builds constants + one fused pallas_call).
# ----------------------------------------------------------------------------
def dfterm_err_forward(z, x, y, p):
    f32 = jnp.float32
    B, outband, Hz, Wz = z.shape
    inband = x.shape[1]
    Hy, Wy = y.shape[2], y.shape[3]
    HWz, HWy = Hz * Wz, Hy * Wy

    # Static flat-roll amounts for each 3x3 tap (out[f] = in[f + dy*W + dx]).
    shifts_z = tuple(int((-(dy * Wz + dx)) % HWz) for dy, dx in _TAPS)
    shifts_y = tuple(int((-(dy * Wy + dx)) % HWy) for dy, dx in _TAPS)

    # --- lane-dense flat activations (C, H*W) ------------------------------
    x_f = x.reshape(B, inband, HWz).astype(f32)
    z_f = z.reshape(B, outband, HWz).astype(f32)
    y_f = y.reshape(B, outband, HWy).astype(f32)

    # --- constants: hoisted border masks & Kronecker resize matrices -------
    maskz = _tap_masks(Hz, Wz)                                   # (9, HWz)
    masky = _tap_masks(Hy, Wy)                                   # (9, HWy)
    rdnT = jnp.einsum("ab,cd->acbd", _bilinear_matrix(Hz, Hy),
                      _bilinear_matrix(Wz, Wy)).reshape(HWz, HWy).T   # (HWy, HWz)
    rupT = jnp.einsum("ab,cd->acbd", _bilinear_matrix(Hy, Hz),
                      _bilinear_matrix(Wy, Wz)).reshape(HWy, HWz).T   # (HWz, HWy)

    # --- weights as matmul-ready matrices -----------------------------------
    def conv3_mat(w):     # (Cout, Cin, 3, 3) -> (Cout, 9*Cin), tap-major rows
        co, ci = w.shape[0], w.shape[1]
        return jnp.transpose(w, (0, 2, 3, 1)).reshape(co, 9 * ci).astype(f32)

    wdw, bdw = conv3_mat(p["w_dw"]), p["b_dw"].reshape(inband, 1).astype(f32)
    wl1, bl1 = p["w_l1"].astype(f32), p["b_l1"].reshape(inband, 1).astype(f32)
    wl2, bl2 = p["w_l2"].astype(f32), p["b_l2"].reshape(outband, 1).astype(f32)
    wzc1 = p["w_zc1"].reshape(inband, outband).astype(f32)
    bzc1 = p["b_zc1"].reshape(inband, 1).astype(f32)
    wzd, bzd = conv3_mat(p["w_zd"]), p["b_zd"].reshape(inband, 1).astype(f32)
    wfc = p["w_fc"].reshape(inband, outband).astype(f32)
    bfc = p["b_fc"].reshape(inband, 1).astype(f32)
    w1m, b1m = conv3_mat(p["w1"]), p["b1"].reshape(1, 1).astype(f32)
    w2m, b2m = p["w2"].reshape(1, 9).astype(f32), p["b2"].reshape(1, 1).astype(f32)
    w3v, b3v = p["w3"].reshape(-1).astype(f32), p["b3"].reshape(-1).astype(f32)

    # --- the fused kernel ---------------------------------------------------
    def kernel(x_ref, z_ref, y_ref, maskz_ref, masky_ref,
               wdw_ref, bdw_ref, wl1_ref, bl1_ref, wl2_ref, bl2_ref,
               wzc1_ref, bzc1_ref, wzd_ref, bzd_ref, wfc_ref, bfc_ref,
               w1_ref, b1_ref, w2_ref, b2_ref, w3_s, b3_s,
               rdnT_ref, rupT_ref, o_spe_ref, o_spa_ref):
        xv = x_ref[0]                                  # (Cin, HWz)
        zv = z_ref[0]                                  # (Cz,  HWz)
        yv = y_ref[0]                                  # (Cz,  HWy)
        mz = maskz_ref[...]                            # (9, HWz)
        my = masky_ref[...]                            # (9, HWy)

        def tap(v, masks, shifts, t):
            # Zero-padded shifted slab for tap t of a flat (C, H*W) tensor.
            if shifts[t] == 0:
                return v
            return masks[t:t + 1, :] * pltpu.roll(v, shift=shifts[t], axis=1)

        def im2col(v, masks, shifts):
            # (C, HW) -> (9*C, HW), tap-major rows; major-axis concat only.
            return jnp.concatenate([tap(v, masks, shifts, t) for t in range(9)],
                                   axis=0)

        # ------------------------------ SpeD --------------------------------
        # dwconv(x): 3x3 Cin->Cin as one MXU matmul, ReLU, global avg pool.
        xc = jnp.maximum(
            jnp.dot(wdw_ref[...], im2col(xv, mz, shifts_z),
                    preferred_element_type=jnp.float32) + bdw_ref[...], 0.0)
        pooled = jnp.sum(xc, axis=1, keepdims=True) * (1.0 / HWz)   # (Cin, 1)
        wx = jax.nn.sigmoid(
            jnp.dot(wl1_ref[...], pooled, preferred_element_type=jnp.float32)
            + bl1_ref[...])                                         # (Cin, 1)
        wxe = (jnp.dot(wl2_ref[...], wx, preferred_element_type=jnp.float32)
               + bl2_ref[...])                                      # (Cz, 1)

        # z_conv1(z * wxe) 1x1 + ReLU; z_depthwise 3x3 + ReLU (im2col matmul).
        zc = jnp.maximum(
            jnp.dot(wzc1_ref[...], zv * wxe, preferred_element_type=jnp.float32)
            + bzc1_ref[...], 0.0)                                   # (Cin, HWz)
        zd = jnp.maximum(
            jnp.dot(wzd_ref[...], im2col(zc, mz, shifts_z),
                    preferred_element_type=jnp.float32) + bzd_ref[...], 0.0)
        # final_conv(z) 1x1, fused with the error term and the single store.
        fc = (jnp.dot(wfc_ref[...], zv, preferred_element_type=jnp.float32)
              + bfc_ref[...])
        o_spe_ref[0] = zd * wx + fc - xv

        # ------------------------------ SpaD --------------------------------
        # LRSD: conv3x3(Cz->1)+ReLU -> conv3x3(1->1)+Sigmoid  = By (full res).
        h1 = jnp.maximum(
            jnp.dot(w1_ref[...], im2col(yv, my, shifts_y),
                    preferred_element_type=jnp.float32) + b1_ref[...], 0.0)
        By = jax.nn.sigmoid(
            jnp.dot(w2_ref[...], im2col(h1, my, shifts_y),
                    preferred_element_type=jnp.float32) + b2_ref[...])  # (1, HWy)

        # bilinear-down(By) as one flat matmul, then z * By_lr.
        by_lr = jnp.dot(By, rdnT_ref[...], preferred_element_type=jnp.float32)
        zby = zv * by_lr                                            # (Cz, HWz)

        # Shared 3x3 conv_ (1->1) applied per channel: 9 VPU multiply-adds.
        out_lr = jnp.zeros_like(zby) + b3_s[0]
        for t in range(9):
            out_lr = out_lr + w3_s[t] * tap(zby, mz, shifts_z, t)

        # Upsample [out_lr ; z] with a single flat matmul (C folded into M).
        up = jnp.dot(jnp.concatenate([out_lr, zv], axis=0), rupT_ref[...],
                     preferred_element_type=jnp.float32)            # (2Cz, HWy)
        rel = jnp.maximum(up[:outband, :], 0.0)
        z_up = up[outband:, :]

        # 3x3 avg-pool (count_include_pad) as a separable box filter.
        sv = (rel
              + my[1:2, :] * pltpu.roll(rel, shift=Wy, axis=1)         # dy=-1
              + my[7:8, :] * pltpu.roll(rel, shift=HWy - Wy, axis=1))  # dy=+1
        pooled3 = (sv
                   + my[3:4, :] * pltpu.roll(sv, shift=1, axis=1)        # dx=-1
                   + my[5:6, :] * pltpu.roll(sv, shift=HWy - 1, axis=1))  # dx=+1

        o_spa_ref[0] = pooled3 * (1.0 / 9.0) * By + z_up - yv

    # --- specs ---------------------------------------------------------------
    def vspec(shape):
        return pl.BlockSpec(shape, lambda b: (0, 0))

    smem = pl.BlockSpec(memory_space=pltpu.MemorySpace.SMEM)

    in_specs = [
        pl.BlockSpec((1, inband, HWz), lambda b: (b, 0, 0)),     # x
        pl.BlockSpec((1, outband, HWz), lambda b: (b, 0, 0)),    # z
        pl.BlockSpec((1, outband, HWy), lambda b: (b, 0, 0)),    # y
        vspec(maskz.shape), vspec(masky.shape),
        vspec(wdw.shape), vspec(bdw.shape), vspec(wl1.shape), vspec(bl1.shape),
        vspec(wl2.shape), vspec(bl2.shape), vspec(wzc1.shape), vspec(bzc1.shape),
        vspec(wzd.shape), vspec(bzd.shape), vspec(wfc.shape), vspec(bfc.shape),
        vspec(w1m.shape), vspec(b1m.shape), vspec(w2m.shape), vspec(b2m.shape),
        smem, smem,                                              # w3, b3
        vspec(rdnT.shape), vspec(rupT.shape),
    ]
    out_specs = (pl.BlockSpec((1, inband, HWz), lambda b: (b, 0, 0)),
                 pl.BlockSpec((1, outband, HWy), lambda b: (b, 0, 0)))
    out_shape = (jax.ShapeDtypeStruct((B, inband, HWz), f32),
                 jax.ShapeDtypeStruct((B, outband, HWy), f32))

    spe_f, spa_f = pl.pallas_call(
        kernel,
        out_shape=out_shape,
        grid=(B,),
        in_specs=in_specs,
        out_specs=out_specs,
        compiler_params=pltpu.CompilerParams(dimension_semantics=("parallel",)),
    )(x_f, z_f, y_f, maskz, masky,
      wdw, bdw, wl1, bl1, wl2, bl2, wzc1, bzc1, wzd, bzd, wfc, bfc,
      w1m, b1m, w2m, b2m, w3v, b3v, rdnT, rupT)

    return (spe_f.reshape(B, inband, Hz, Wz),
            spa_f.reshape(B, outband, Hy, Wy))


# ----------------------------------------------------------------------------
# Pure-JAX reference (correctness check only).
# ----------------------------------------------------------------------------
def _conv_ref(v, w, b):
    return lax.conv_general_dilated(
        v, w, (1, 1), "SAME",
        dimension_numbers=("NCHW", "OIHW", "NCHW")) + b.reshape(1, -1, 1, 1)


def _resize_ref(v, Ho, Wo):
    _, _, Hi, Wi = v.shape
    if (Ho, Wo) == (Hi, Wi):
        return v
    ah = _bilinear_matrix(Ho, Hi)
    aw = _bilinear_matrix(Wo, Wi)
    t = jnp.einsum("wj,ncij->nciw", aw, v)
    return jnp.einsum("hi,nciw->nchw", ah, t)


def dfterm_err_reference(z, x, y, p):
    B, outband, Hz, Wz = z.shape
    Hy, Wy = y.shape[2], y.shape[3]
    # SpeD
    xp = jax.nn.relu(_conv_ref(x, p["w_dw"], p["b_dw"]))
    pooled = jnp.mean(xp, axis=(2, 3))
    wx = jax.nn.sigmoid(pooled @ p["w_l1"].T + p["b_l1"])
    wxe = wx @ p["w_l2"].T + p["b_l2"]
    zw = z * wxe[:, :, None, None]
    zc = jax.nn.relu(_conv_ref(zw, p["w_zc1"], p["b_zc1"]))
    zd = jax.nn.relu(_conv_ref(zc, p["w_zd"], p["b_zd"]))
    sped_out = _conv_ref(z, p["w_fc"], p["b_fc"]) + zd * wx[:, :, None, None]
    # SpaD
    h = jax.nn.relu(_conv_ref(y, p["w1"], p["b1"]))
    By = jax.nn.sigmoid(_conv_ref(h, p["w2"], p["b2"]))
    By_ = _resize_ref(By, Hz, Wz)
    out = _conv_ref((z * By_).reshape(B * outband, 1, Hz, Wz),
                    p["w3"], p["b3"]).reshape(B, outband, Hz, Wz)
    out = _resize_ref(out, Hy, Wy)
    pooled3 = lax.conv_general_dilated(
        jax.nn.relu(out).reshape(B * outband, 1, Hy, Wy),
        jnp.ones((1, 1, 3, 3), jnp.float32) / 9.0, (1, 1), "SAME",
        dimension_numbers=("NCHW", "OIHW", "NCHW")).reshape(B, outband, Hy, Wy)
    spad_out = pooled3 * By + _resize_ref(z, Hy, Wy)
    return sped_out - x, spad_out - y


if __name__ == "__main__":
    key = jax.random.PRNGKey(0)
    ks = jax.random.split(key, 24)

    B, inband, outband = 2, 8, 4
    Hz = Wz = 8          # z / x spatial (low-res)
    Hy = Wy = 16         # y spatial (high-res)

    z = jax.random.normal(ks[0], (B, outband, Hz, Wz), jnp.float32)
    x = jax.random.normal(ks[1], (B, inband, Hz, Wz), jnp.float32)
    y = jax.random.normal(ks[2], (B, outband, Hy, Wy), jnp.float32)

    def rnd(k, shape, s):
        return jax.random.normal(k, shape, jnp.float32) * s

    params = {
        # SpeD
        "w_dw": rnd(ks[3], (inband, inband, 3, 3), 0.15), "b_dw": rnd(ks[4], (inband,), 0.1),
        "w_l1": rnd(ks[5], (inband, inband), 0.3),        "b_l1": rnd(ks[6], (inband,), 0.1),
        "w_l2": rnd(ks[7], (outband, inband), 0.3),       "b_l2": rnd(ks[8], (outband,), 0.1),
        "w_zc1": rnd(ks[9], (inband, outband, 1, 1), 0.3), "b_zc1": rnd(ks[10], (inband,), 0.1),
        "w_zd": rnd(ks[11], (inband, inband, 3, 3), 0.15), "b_zd": rnd(ks[12], (inband,), 0.1),
        "w_fc": rnd(ks[13], (inband, outband, 1, 1), 0.3), "b_fc": rnd(ks[14], (inband,), 0.1),
        # SpaD
        "w1": rnd(ks[15], (1, outband, 3, 3), 0.2), "b1": rnd(ks[16], (1,), 0.1),
        "w2": rnd(ks[17], (1, 1, 3, 3), 0.2),       "b2": rnd(ks[18], (1,), 0.1),
        "w3": rnd(ks[19], (1, 1, 3, 3), 0.2),       "b3": rnd(ks[20], (1,), 0.1),
    }

    spe_err, spa_err = jax.jit(dfterm_err_forward)(z, x, y, params)
    spe_err, spa_err = jax.block_until_ready((spe_err, spa_err))

    spe_ref, spa_ref = dfterm_err_reference(z, x, y, params)
    assert spe_err.shape == (B, inband, Hz, Wz), spe_err.shape
    assert spa_err.shape == (B, outband, Hy, Wy), spa_err.shape
    assert jnp.allclose(spe_err, spe_ref, rtol=1e-2, atol=1e-2), \
        float(jnp.max(jnp.abs(spe_err - spe_ref)))
    assert jnp.allclose(spa_err, spa_ref, rtol=1e-2, atol=1e-2), \
        float(jnp.max(jnp.abs(spa_err - spa_ref)))

    print("KERNEL_OK")
</pallas_src>

<mosaic_0001>
module attributes {stable_mosaic.version = 11 : i64} {
  func.func private @main(%arg0: i32) attributes {dimension_semantics = [#tpu.dimension_semantics<core_parallel>], iteration_bounds = array<i64: 2>, tpu.core_type = #tpu.core_type<sc_scalar_subcore>, window_params = []} {
    return
  }
}

module attributes {stable_mosaic.version = 11 : i64} {
  func.func private @main(%arg0: i32) attributes {dimension_semantics = [#tpu.dimension_semantics<core_parallel>], iteration_bounds = array<i64: 2>, tpu.core_type = #tpu.core_type<sc_scalar_subcore>, window_params = []} {
    return
  }
}

module attributes {stable_mosaic.version = 11 : i64} {
  func.func @kernel(%arg0: i32, %arg1: memref<1x8x64xf32, #tpu.memory_space<vmem>>, %arg2: memref<1x4x64xf32, #tpu.memory_space<vmem>>, %arg3: memref<1x4x256xf32, #tpu.memory_space<vmem>>, %arg4: memref<9x64xf32, #tpu.memory_space<vmem>>, %arg5: memref<9x256xf32, #tpu.memory_space<vmem>>, %arg6: memref<8x72xf32, #tpu.memory_space<vmem>>, %arg7: memref<8x1xf32, #tpu.memory_space<vmem>>, %arg8: memref<8x8xf32, #tpu.memory_space<vmem>>, %arg9: memref<8x1xf32, #tpu.memory_space<vmem>>, %arg10: memref<4x8xf32, #tpu.memory_space<vmem>>, %arg11: memref<4x1xf32, #tpu.memory_space<vmem>>, %arg12: memref<8x4xf32, #tpu.memory_space<vmem>>, %arg13: memref<8x1xf32, #tpu.memory_space<vmem>>, %arg14: memref<8x72xf32, #tpu.memory_space<vmem>>, %arg15: memref<8x1xf32, #tpu.memory_space<vmem>>, %arg16: memref<8x4xf32, #tpu.memory_space<vmem>>, %arg17: memref<8x1xf32, #tpu.memory_space<vmem>>, %arg18: memref<1x36xf32, #tpu.memory_space<vmem>>, %arg19: memref<1x1xf32, #tpu.memory_space<vmem>>, %arg20: memref<1x9xf32, #tpu.memory_space<vmem>>, %arg21: memref<1x1xf32, #tpu.memory_space<vmem>>, %arg22: memref<9xf32, #tpu.memory_space<smem>>, %arg23: memref<1xf32, #tpu.memory_space<smem>>, %arg24: memref<256x64xf32, #tpu.memory_space<vmem>>, %arg25: memref<64x256xf32, #tpu.memory_space<vmem>>, %arg26: memref<1x8x64xf32, #tpu.memory_space<vmem>>, %arg27: memref<1x4x256xf32, #tpu.memory_space<vmem>>) attributes {dimension_semantics = [#tpu.dimension_semantics<parallel>], iteration_bounds = array<i64: 2>, scalar_prefetch = 0 : i64, scratch_operands = 0 : i64, tpu.core_type = #tpu.core_type<tc>, window_params = [{transform_indices = @transform_0, window_bounds = array<i64: 1, 8, 64>}, {transform_indices = @transform_1, window_bounds = array<i64: 1, 4, 64>}, {transform_indices = @transform_2, window_bounds = array<i64: 1, 4, 256>}, {pipeline_mode = #tpu.pipeline_mode<synchronous>, transform_indices = @transform_3, window_bounds = array<i64: 9, 64>}, {pipeline_mode = #tpu.pipeline_mode<synchronous>, transform_indices = @transform_4, window_bounds = array<i64: 9, 256>}, {pipeline_mode = #tpu.pipeline_mode<synchronous>, transform_indices = @transform_5, window_bounds = array<i64: 8, 72>}, {pipeline_mode = #tpu.pipeline_mode<synchronous>, transform_indices = @transform_6, window_bounds = array<i64: 8, 1>}, {pipeline_mode = #tpu.pipeline_mode<synchronous>, transform_indices = @transform_7, window_bounds = array<i64: 8, 8>}, {pipeline_mode = #tpu.pipeline_mode<synchronous>, transform_indices = @transform_8, window_bounds = array<i64: 8, 1>}, {pipeline_mode = #tpu.pipeline_mode<synchronous>, transform_indices = @transform_9, window_bounds = array<i64: 4, 8>}, {pipeline_mode = #tpu.pipeline_mode<synchronous>, transform_indices = @transform_10, window_bounds = array<i64: 4, 1>}, {pipeline_mode = #tpu.pipeline_mode<synchronous>, transform_indices = @transform_11, window_bounds = array<i64: 8, 4>}, {pipeline_mode = #tpu.pipeline_mode<synchronous>, transform_indices = @transform_12, window_bounds = array<i64: 8, 1>}, {pipeline_mode = #tpu.pipeline_mode<synchronous>, transform_indices = @transform_13, window_bounds = array<i64: 8, 72>}, {pipeline_mode = #tpu.pipeline_mode<synchronous>, transform_indices = @transform_14, window_bounds = array<i64: 8, 1>}, {pipeline_mode = #tpu.pipeline_mode<synchronous>, transform_indices = @transform_15, window_bounds = array<i64: 8, 4>}, {pipeline_mode = #tpu.pipeline_mode<synchronous>, transform_indices = @transform_16, window_bounds = array<i64: 8, 1>}, {pipeline_mode = #tpu.pipeline_mode<synchronous>, transform_indices = @transform_17, window_bounds = array<i64: 1, 36>}, {pipeline_mode = #tpu.pipeline_mode<synchronous>, transform_indices = @transform_18, window_bounds = array<i64: 1, 1>}, {pipeline_mode = #tpu.pipeline_mode<synchronous>, transform_indices = @transform_19, window_bounds = array<i64: 1, 9>}, {pipeline_mode = #tpu.pipeline_mode<synchronous>, transform_indices = @transform_20, window_bounds = array<i64: 1, 1>}, {transform_indices = @transform_21, window_bounds = array<i64: 9>}, {transform_indices = @transform_22, window_bounds = array<i64: 1>}, {pipeline_mode = #tpu.pipeline_mode<synchronous>, transform_indices = @transform_23, window_bounds = array<i64: 256, 64>}, {pipeline_mode = #tpu.pipeline_mode<synchronous>, transform_indices = @transform_24, window_bounds = array<i64: 64, 256>}, {transform_indices = @transform_25, window_bounds = array<i64: 1, 8, 64>}, {transform_indices = @transform_26, window_bounds = array<i64: 1, 4, 256>}]} {
    %c0 = arith.constant 0 : index
    %c0_0 = arith.constant 0 : index
    %c0_1 = arith.constant 0 : index
    %0 = vector.load %arg1[%c0, %c0_0, %c0_1] : memref<1x8x64xf32, #tpu.memory_space<vmem>>, vector<1x8x64xf32>
    %1 = vector.shape_cast %0 : vector<1x8x64xf32> to vector<8x64xf32>
    %c0_2 = arith.constant 0 : index
    %c0_3 = arith.constant 0 : index
    %c0_4 = arith.constant 0 : index
    %2 = vector.load %arg2[%c0_2, %c0_3, %c0_4] : memref<1x4x64xf32, #tpu.memory_space<vmem>>, vector<1x4x64xf32>
    %3 = vector.shape_cast %2 : vector<1x4x64xf32> to vector<4x64xf32>
    %c0_5 = arith.constant 0 : index
    %c0_6 = arith.constant 0 : index
    %c0_7 = arith.constant 0 : index
    %4 = vector.load %arg3[%c0_5, %c0_6, %c0_7] : memref<1x4x256xf32, #tpu.memory_space<vmem>>, vector<1x4x256xf32>
    %5 = vector.shape_cast %4 : vector<1x4x256xf32> to vector<4x256xf32>
    %c0_8 = arith.constant 0 : index
    %c0_9 = arith.constant 0 : index
    %6 = vector.load %arg4[%c0_8, %c0_9] : memref<9x64xf32, #tpu.memory_space<vmem>>, vector<9x64xf32>
    %c0_10 = arith.constant 0 : index
    %c0_11 = arith.constant 0 : index
    %7 = vector.load %arg5[%c0_10, %c0_11] : memref<9x256xf32, #tpu.memory_space<vmem>>, vector<9x256xf32>
    %c0_12 = arith.constant 0 : index
    %c0_13 = arith.constant 0 : index
    %8 = vector.load %arg6[%c0_12, %c0_13] : memref<8x72xf32, #tpu.memory_space<vmem>>, vector<8x72xf32>
    %9 = vector.extract_strided_slice %6 {offsets = [0, 0], sizes = [1, 64], strides = [1, 1]} : vector<9x64xf32> to vector<1x64xf32>
    %c9_i32 = arith.constant 9 : i32
    %10 = tpu.dynamic_rotate %1 by %c9_i32 dim 1 : vector<8x64xf32>, i32 -> vector<8x64xf32>
    %11 = vector.broadcast %9 : vector<1x64xf32> to vector<8x64xf32>
    %12 = arith.mulf %11, %10 : vector<8x64xf32>
    %13 = vector.extract_strided_slice %6 {offsets = [1, 0], sizes = [1, 64], strides = [1, 1]} : vector<9x64xf32> to vector<1x64xf32>
    %c8_i32 = arith.constant 8 : i32
    %14 = tpu.dynamic_rotate %1 by %c8_i32 dim 1 : vector<8x64xf32>, i32 -> vector<8x64xf32>
    %15 = vector.broadcast %13 : vector<1x64xf32> to vector<8x64xf32>
    %16 = arith.mulf %15, %14 : vector<8x64xf32>
    %17 = vector.extract_strided_slice %6 {offsets = [2, 0], sizes = [1, 64], strides = [1, 1]} : vector<9x64xf32> to vector<1x64xf32>
    %c7_i32 = arith.constant 7 : i32
    %18 = tpu.dynamic_rotate %1 by %c7_i32 dim 1 : vector<8x64xf32>, i32 -> vector<8x64xf32>
    %19 = vector.broadcast %17 : vector<1x64xf32> to vector<8x64xf32>
    %20 = arith.mulf %19, %18 : vector<8x64xf32>
    %21 = vector.extract_strided_slice %6 {offsets = [3, 0], sizes = [1, 64], strides = [1, 1]} : vector<9x64xf32> to vector<1x64xf32>
    %c1_i32 = arith.constant 1 : i32
    %22 = tpu.dynamic_rotate %1 by %c1_i32 dim 1 : vector<8x64xf32>, i32 -> vector<8x64xf32>
    %23 = vector.broadcast %21 : vector<1x64xf32> to vector<8x64xf32>
    %24 = arith.mulf %23, %22 : vector<8x64xf32>
    %25 = vector.extract_strided_slice %6 {offsets = [5, 0], sizes = [1, 64], strides = [1, 1]} : vector<9x64xf32> to vector<1x64xf32>
    %c63_i32 = arith.constant 63 : i32
    %26 = tpu.dynamic_rotate %1 by %c63_i32 dim 1 : vector<8x64xf32>, i32 -> vector<8x64xf32>
    %27 = vector.broadcast %25 : vector<1x64xf32> to vector<8x64xf32>
    %28 = arith.mulf %27, %26 : vector<8x64xf32>
    %29 = vector.extract_strided_slice %6 {offsets = [6, 0], sizes = [1, 64], strides = [1, 1]} : vector<9x64xf32> to vector<1x64xf32>
    %c57_i32 = arith.constant 57 : i32
    %30 = tpu.dynamic_rotate %1 by %c57_i32 dim 1 : vector<8x64xf32>, i32 -> vector<8x64xf32>
    %31 = vector.broadcast %29 : vector<1x64xf32> to vector<8x64xf32>
    %32 = arith.mulf %31, %30 : vector<8x64xf32>
    %33 = vector.extract_strided_slice %6 {offsets = [7, 0], sizes = [1, 64], strides = [1, 1]} : vector<9x64xf32> to vector<1x64xf32>
    %c56_i32 = arith.constant 56 : i32
    %34 = tpu.dynamic_rotate %1 by %c56_i32 dim 1 : vector<8x64xf32>, i32 -> vector<8x64xf32>
    %35 = vector.broadcast %33 : vector<1x64xf32> to vector<8x64xf32>
    %36 = arith.mulf %35, %34 : vector<8x64xf32>
    %37 = vector.extract_strided_slice %6 {offsets = [8, 0], sizes = [1, 64], strides = [1, 1]} : vector<9x64xf32> to vector<1x64xf32>
    %c55_i32 = arith.constant 55 : i32
    %38 = tpu.dynamic_rotate %1 by %c55_i32 dim 1 : vector<8x64xf32>, i32 -> vector<8x64xf32>
    %39 = vector.broadcast %37 : vector<1x64xf32> to vector<8x64xf32>
    %40 = arith.mulf %39, %38 : vector<8x64xf32>
    %41 = tpu.concatenate %12, %16, %20, %24, %1, %28, %32, %36, %40 in 0 : vector<8x64xf32>, vector<8x64xf32>, vector<8x64xf32>, vector<8x64xf32>, vector<8x64xf32>, vector<8x64xf32>, vector<8x64xf32>, vector<8x64xf32>, vector<8x64xf32> -> vector<72x64xf32>
    %cst = arith.constant dense<0.000000e+00> : vector<8x64xf32>
    %42 = tpu.matmul %8, %41, %cst {dimension_numbers = #tpu.dot_dimension_numbers<[1], [0], [0], [1], [0, 0, 1, 1], [], []>} : vector<8x72xf32>, vector<72x64xf32>, vector<8x64xf32> -> vector<8x64xf32>
    %c0_14 = arith.constant 0 : index
    %c0_15 = arith.constant 0 : index
    %43 = vector.load %arg7[%c0_14, %c0_15] : memref<8x1xf32, #tpu.memory_space<vmem>>, vector<8x1xf32>
    %44 = vector.broadcast %43 : vector<8x1xf32> to vector<8x64xf32>
    %45 = arith.addf %42, %44 : vector<8x64xf32>
    %cst_16 = arith.constant 0.000000e+00 : f32
    %46 = vector.broadcast %cst_16 : f32 to vector<8x64xf32>
    %47 = arith.maximumf %45, %46 : vector<8x64xf32>
    %cst_17 = arith.constant dense<0.000000e+00> : vector<8xf32>
    %48 = vector.multi_reduction <add>, %47, %cst_17 [1] : vector<8x64xf32> to vector<8xf32>
    %49 = vector.shape_cast %48 : vector<8xf32> to vector<8x1xf32>
    %cst_18 = arith.constant 1.562500e-02 : f32
    %50 = vector.broadcast %cst_18 : f32 to vector<8x1xf32>
    %51 = arith.mulf %49, %50 : vector<8x1xf32>
    %c0_19 = arith.constant 0 : index
    %c0_20 = arith.constant 0 : index
    %52 = vector.load %arg8[%c0_19, %c0_20] : memref<8x8xf32, #tpu.memory_space<vmem>>, vector<8x8xf32>
    %cst_21 = arith.constant dense<0.000000e+00> : vector<8x1xf32>
    %53 = tpu.matmul %52, %51, %cst_21 {dimension_numbers = #tpu.dot_dimension_numbers<[1], [0], [0], [1], [0, 0, 1, 1], [], []>} : vector<8x8xf32>, vector<8x1xf32>, vector<8x1xf32> -> vector<8x1xf32>
    %c0_22 = arith.constant 0 : index
    %c0_23 = arith.constant 0 : index
    %54 = vector.load %arg9[%c0_22, %c0_23] : memref<8x1xf32, #tpu.memory_space<vmem>>, vector<8x1xf32>
    %55 = arith.addf %53, %54 : vector<8x1xf32>
    %56 = arith.negf %55 : vector<8x1xf32>
    %57 = math.exp %56 : vector<8x1xf32>
    %cst_24 = arith.constant 1.000000e+00 : f32
    %58 = vector.broadcast %cst_24 : f32 to vector<8x1xf32>
    %59 = arith.addf %58, %57 : vector<8x1xf32>
    %60 = arith.divf %58, %59 : vector<8x1xf32>
    %c0_25 = arith.constant 0 : index
    %c0_26 = arith.constant 0 : index
    %61 = vector.load %arg10[%c0_25, %c0_26] : memref<4x8xf32, #tpu.memory_space<vmem>>, vector<4x8xf32>
    %cst_27 = arith.constant dense<0.000000e+00> : vector<4x1xf32>
    %62 = tpu.matmul %61, %60, %cst_27 {dimension_numbers = #tpu.dot_dimension_numbers<[1], [0], [0], [1], [0, 0, 1, 1], [], []>} : vector<4x8xf32>, vector<8x1xf32>, vector<4x1xf32> -> vector<4x1xf32>
    %c0_28 = arith.constant 0 : index
    %c0_29 = arith.constant 0 : index
    %63 = vector.load %arg11[%c0_28, %c0_29] : memref<4x1xf32, #tpu.memory_space<vmem>>, vector<4x1xf32>
    %64 = arith.addf %62, %63 : vector<4x1xf32>
    %c0_30 = arith.constant 0 : index
    %c0_31 = arith.constant 0 : index
    %65 = vector.load %arg12[%c0_30, %c0_31] : memref<8x4xf32, #tpu.memory_space<vmem>>, vector<8x4xf32>
    %66 = vector.broadcast %64 : vector<4x1xf32> to vector<4x64xf32>
    %67 = arith.mulf %3, %66 : vector<4x64xf32>
    %cst_32 = arith.constant dense<0.000000e+00> : vector<8x64xf32>
    %68 = tpu.matmul %65, %67, %cst_32 {dimension_numbers = #tpu.dot_dimension_numbers<[1], [0], [0], [1], [0, 0, 1, 1], [], []>} : vector<8x4xf32>, vector<4x64xf32>, vector<8x64xf32> -> vector<8x64xf32>
    %c0_33 = arith.constant 0 : index
    %c0_34 = arith.constant 0 : index
    %69 = vector.load %arg13[%c0_33, %c0_34] : memref<8x1xf32, #tpu.memory_space<vmem>>, vector<8x1xf32>
    %70 = vector.broadcast %69 : vector<8x1xf32> to vector<8x64xf32>
    %71 = arith.addf %68, %70 : vector<8x64xf32>
    %cst_35 = arith.constant 0.000000e+00 : f32
    %72 = vector.broadcast %cst_35 : f32 to vector<8x64xf32>
    %73 = arith.maximumf %71, %72 : vector<8x64xf32>
    %c0_36 = arith.constant 0 : index
    %c0_37 = arith.constant 0 : index
    %74 = vector.load %arg14[%c0_36, %c0_37] : memref<8x72xf32, #tpu.memory_space<vmem>>, vector<8x72xf32>
    %75 = vector.extract_strided_slice %6 {offsets = [0, 0], sizes = [1, 64], strides = [1, 1]} : vector<9x64xf32> to vector<1x64xf32>
    %c9_i32_38 = arith.constant 9 : i32
    %76 = tpu.dynamic_rotate %73 by %c9_i32_38 dim 1 : vector<8x64xf32>, i32 -> vector<8x64xf32>
    %77 = vector.broadcast %75 : vector<1x64xf32> to vector<8x64xf32>
    %78 = arith.mulf %77, %76 : vector<8x64xf32>
    %79 = vector.extract_strided_slice %6 {offsets = [1, 0], sizes = [1, 64], strides = [1, 1]} : vector<9x64xf32> to vector<1x64xf32>
    %c8_i32_39 = arith.constant 8 : i32
    %80 = tpu.dynamic_rotate %73 by %c8_i32_39 dim 1 : vector<8x64xf32>, i32 -> vector<8x64xf32>
    %81 = vector.broadcast %79 : vector<1x64xf32> to vector<8x64xf32>
    %82 = arith.mulf %81, %80 : vector<8x64xf32>
    %83 = vector.extract_strided_slice %6 {offsets = [2, 0], sizes = [1, 64], strides = [1, 1]} : vector<9x64xf32> to vector<1x64xf32>
    %c7_i32_40 = arith.constant 7 : i32
    %84 = tpu.dynamic_rotate %73 by %c7_i32_40 dim 1 : vector<8x64xf32>, i32 -> vector<8x64xf32>
    %85 = vector.broadcast %83 : vector<1x64xf32> to vector<8x64xf32>
    %86 = arith.mulf %85, %84 : vector<8x64xf32>
    %87 = vector.extract_strided_slice %6 {offsets = [3, 0], sizes = [1, 64], strides = [1, 1]} : vector<9x64xf32> to vector<1x64xf32>
    %c1_i32_41 = arith.constant 1 : i32
    %88 = tpu.dynamic_rotate %73 by %c1_i32_41 dim 1 : vector<8x64xf32>, i32 -> vector<8x64xf32>
    %89 = vector.broadcast %87 : vector<1x64xf32> to vector<8x64xf32>
    %90 = arith.mulf %89, %88 : vector<8x64xf32>
    %91 = vector.extract_strided_slice %6 {offsets = [5, 0], sizes = [1, 64], strides = [1, 1]} : vector<9x64xf32> to vector<1x64xf32>
    %c63_i32_42 = arith.constant 63 : i32
    %92 = tpu.dynamic_rotate %73 by %c63_i32_42 dim 1 : vector<8x64xf32>, i32 -> vector<8x64xf32>
    %93 = vector.broadcast %91 : vector<1x64xf32> to vector<8x64xf32>
    %94 = arith.mulf %93, %92 : vector<8x64xf32>
    %95 = vector.extract_strided_slice %6 {offsets = [6, 0], sizes = [1, 64], strides = [1, 1]} : vector<9x64xf32> to vector<1x64xf32>
    %c57_i32_43 = arith.constant 57 : i32
    %96 = tpu.dynamic_rotate %73 by %c57_i32_43 dim 1 : vector<8x64xf32>, i32 -> vector<8x64xf32>
    %97 = vector.broadcast %95 : vector<1x64xf32> to vector<8x64xf32>
    %98 = arith.mulf %97, %96 : vector<8x64xf32>
    %99 = vector.extract_strided_slice %6 {offsets = [7, 0], sizes = [1, 64], strides = [1, 1]} : vector<9x64xf32> to vector<1x64xf32>
    %c56_i32_44 = arith.constant 56 : i32
    %100 = tpu.dynamic_rotate %73 by %c56_i32_44 dim 1 : vector<8x64xf32>, i32 -> vector<8x64xf32>
    %101 = vector.broadcast %99 : vector<1x64xf32> to vector<8x64xf32>
    %102 = arith.mulf %101, %100 : vector<8x64xf32>
    %103 = vector.extract_strided_slice %6 {offsets = [8, 0], sizes = [1, 64], strides = [1, 1]} : vector<9x64xf32> to vector<1x64xf32>
    %c55_i32_45 = arith.constant 55 : i32
    %104 = tpu.dynamic_rotate %73 by %c55_i32_45 dim 1 : vector<8x64xf32>, i32 -> vector<8x64xf32>
    %105 = vector.broadcast %103 : vector<1x64xf32> to vector<8x64xf32>
    %106 = arith.mulf %105, %104 : vector<8x64xf32>
    %107 = tpu.concatenate %78, %82, %86, %90, %73, %94, %98, %102, %106 in 0 : vector<8x64xf32>, vector<8x64xf32>, vector<8x64xf32>, vector<8x64xf32>, vector<8x64xf32>, vector<8x64xf32>, vector<8x64xf32>, vector<8x64xf32>, vector<8x64xf32> -> vector<72x64xf32>
    %cst_46 = arith.constant dense<0.000000e+00> : vector<8x64xf32>
    %108 = tpu.matmul %74, %107, %cst_46 {dimension_numbers = #tpu.dot_dimension_numbers<[1], [0], [0], [1], [0, 0, 1, 1], [], []>} : vector<8x72xf32>, vector<72x64xf32>, vector<8x64xf32> -> vector<8x64xf32>
    %c0_47 = arith.constant 0 : index
    %c0_48 = arith.constant 0 : index
    %109 = vector.load %arg15[%c0_47, %c0_48] : memref<8x1xf32, #tpu.memory_space<vmem>>, vector<8x1xf32>
    %110 = vector.broadcast %109 : vector<8x1xf32> to vector<8x64xf32>
    %111 = arith.addf %108, %110 : vector<8x64xf32>
    %cst_49 = arith.constant 0.000000e+00 : f32
    %112 = vector.broadcast %cst_49 : f32 to vector<8x64xf32>
    %113 = arith.maximumf %111, %112 : vector<8x64xf32>
    %c0_50 = arith.constant 0 : index
    %c0_51 = arith.constant 0 : index
    %114 = vector.load %arg16[%c0_50, %c0_51] : memref<8x4xf32, #tpu.memory_space<vmem>>, vector<8x4xf32>
    %cst_52 = arith.constant dense<0.000000e+00> : vector<8x64xf32>
    %115 = tpu.matmul %114, %3, %cst_52 {dimension_numbers = #tpu.dot_dimension_numbers<[1], [0], [0], [1], [0, 0, 1, 1], [], []>} : vector<8x4xf32>, vector<4x64xf32>, vector<8x64xf32> -> vector<8x64xf32>
    %c0_53 = arith.constant 0 : index
    %c0_54 = arith.constant 0 : index
    %116 = vector.load %arg17[%c0_53, %c0_54] : memref<8x1xf32, #tpu.memory_space<vmem>>, vector<8x1xf32>
    %117 = vector.broadcast %116 : vector<8x1xf32> to vector<8x64xf32>
    %118 = arith.addf %115, %117 : vector<8x64xf32>
    %119 = vector.broadcast %60 : vector<8x1xf32> to vector<8x64xf32>
    %120 = arith.mulf %113, %119 : vector<8x64xf32>
    %121 = arith.addf %120, %118 : vector<8x64xf32>
    %122 = arith.subf %121, %1 : vector<8x64xf32>
    %c0_55 = arith.constant 0 : index
    %c0_56 = arith.constant 0 : index
    %c0_57 = arith.constant 0 : index
    %123 = vector.load %arg26[%c0_55, %c0_56, %c0_57] : memref<1x8x64xf32, #tpu.memory_space<vmem>>, vector<1x8x64xf32>
    %124 = vector.shape_cast %123 : vector<1x8x64xf32> to vector<8x64xf32>
    %125 = vector.shape_cast %122 : vector<8x64xf32> to vector<1x8x64xf32>
    tpu.vector_store %arg26[%c0_55, %c0_56, %c0_57], %125 {strides = array<i32>} : memref<1x8x64xf32, #tpu.memory_space<vmem>>, vector<1x8x64xf32>,
    %c0_58 = arith.constant 0 : index
    %c0_59 = arith.constant 0 : index
    %126 = vector.load %arg18[%c0_58, %c0_59] : memref<1x36xf32, #tpu.memory_space<vmem>>, vector<1x36xf32>
    %127 = vector.extract_strided_slice %7 {offsets = [0, 0], sizes = [1, 256], strides = [1, 1]} : vector<9x256xf32> to vector<1x256xf32>
    %c17_i32 = arith.constant 17 : i32
    %128 = tpu.dynamic_rotate %5 by %c17_i32 dim 1 : vector<4x256xf32>, i32 -> vector<4x256xf32>
    %129 = vector.broadcast %127 : vector<1x256xf32> to vector<4x256xf32>
    %130 = arith.mulf %129, %128 : vector<4x256xf32>
    %131 = vector.extract_strided_slice %7 {offsets = [1, 0], sizes = [1, 256], strides = [1, 1]} : vector<9x256xf32> to vector<1x256xf32>
    %c16_i32 = arith.constant 16 : i32
    %132 = tpu.dynamic_rotate %5 by %c16_i32 dim 1 : vector<4x256xf32>, i32 -> vector<4x256xf32>
    %133 = vector.broadcast %131 : vector<1x256xf32> to vector<4x256xf32>
    %134 = arith.mulf %133, %132 : vector<4x256xf32>
    %135 = vector.extract_strided_slice %7 {offsets = [2, 0], sizes = [1, 256], strides = [1, 1]} : vector<9x256xf32> to vector<1x256xf32>
    %c15_i32 = arith.constant 15 : i32
    %136 = tpu.dynamic_rotate %5 by %c15_i32 dim 1 : vector<4x256xf32>, i32 -> vector<4x256xf32>
    %137 = vector.broadcast %135 : vector<1x256xf32> to vector<4x256xf32>
    %138 = arith.mulf %137, %136 : vector<4x256xf32>
    %139 = vector.extract_strided_slice %7 {offsets = [3, 0], sizes = [1, 256], strides = [1, 1]} : vector<9x256xf32> to vector<1x256xf32>
    %c1_i32_60 = arith.constant 1 : i32
    %140 = tpu.dynamic_rotate %5 by %c1_i32_60 dim 1 : vector<4x256xf32>, i32 -> vector<4x256xf32>
    %141 = vector.broadcast %139 : vector<1x256xf32> to vector<4x256xf32>
    %142 = arith.mulf %141, %140 : vector<4x256xf32>
    %143 = vector.extract_strided_slice %7 {offsets = [5, 0], sizes = [1, 256], strides = [1, 1]} : vector<9x256xf32> to vector<1x256xf32>
    %c255_i32 = arith.constant 255 : i32
    %144 = tpu.dynamic_rotate %5 by %c255_i32 dim 1 : vector<4x256xf32>, i32 -> vector<4x256xf32>
    %145 = vector.broadcast %143 : vector<1x256xf32> to vector<4x256xf32>
    %146 = arith.mulf %145, %144 : vector<4x256xf32>
    %147 = vector.extract_strided_slice %7 {offsets = [6, 0], sizes = [1, 256], strides = [1, 1]} : vector<9x256xf32> to vector<1x256xf32>
    %c241_i32 = arith.constant 241 : i32
    %148 = tpu.dynamic_rotate %5 by %c241_i32 dim 1 : vector<4x256xf32>, i32 -> vector<4x256xf32>
    %149 = vector.broadcast %147 : vector<1x256xf32> to vector<4x256xf32>
    %150 = arith.mulf %149, %148 : vector<4x256xf32>
    %151 = vector.extract_strided_slice %7 {offsets = [7, 0], sizes = [1, 256], strides = [1, 1]} : vector<9x256xf32> to vector<1x256xf32>
    %c240_i32 = arith.constant 240 : i32
    %152 = tpu.dynamic_rotate %5 by %c240_i32 dim 1 : vector<4x256xf32>, i32 -> vector<4x256xf32>
    %153 = vector.broadcast %151 : vector<1x256xf32> to vector<4x256xf32>
    %154 = arith.mulf %153, %152 : vector<4x256xf32>
    %155 = vector.extract_strided_slice %7 {offsets = [8, 0], sizes = [1, 256], strides = [1, 1]} : vector<9x256xf32> to vector<1x256xf32>
    %c239_i32 = arith.constant 239 : i32
    %156 = tpu.dynamic_rotate %5 by %c239_i32 dim 1 : vector<4x256xf32>, i32 -> vector<4x256xf32>
    %157 = vector.broadcast %155 : vector<1x256xf32> to vector<4x256xf32>
    %158 = arith.mulf %157, %156 : vector<4x256xf32>
    %159 = tpu.concatenate %130, %134, %138, %142, %5, %146, %150, %154, %158 in 0 : vector<4x256xf32>, vector<4x256xf32>, vector<4x256xf32>, vector<4x256xf32>, vector<4x256xf32>, vector<4x256xf32>, vector<4x256xf32>, vector<4x256xf32>, vector<4x256xf32> -> vector<36x256xf32>
    %cst_61 = arith.constant dense<0.000000e+00> : vector<1x256xf32>
    %160 = tpu.matmul %126, %159, %cst_61 {dimension_numbers = #tpu.dot_dimension_numbers<[1], [0], [0], [1], [0, 0, 1, 1], [], []>} : vector<1x36xf32>, vector<36x256xf32>, vector<1x256xf32> -> vector<1x256xf32>
    %c0_62 = arith.constant 0 : index
    %c0_63 = arith.constant 0 : index
    %161 = vector.load %arg19[%c0_62, %c0_63] : memref<1x1xf32, #tpu.memory_space<vmem>>, vector<1x1xf32>
    %162 = vector.broadcast %161 : vector<1x1xf32> to vector<1x256xf32>
    %163 = arith.addf %160, %162 : vector<1x256xf32>
    %cst_64 = arith.constant 0.000000e+00 : f32
    %164 = vector.broadcast %cst_64 : f32 to vector<1x256xf32>
    %165 = arith.maximumf %163, %164 : vector<1x256xf32>
    %c0_65 = arith.constant 0 : index
    %c0_66 = arith.constant 0 : index
    %166 = vector.load %arg20[%c0_65, %c0_66] : memref<1x9xf32, #tpu.memory_space<vmem>>, vector<1x9xf32>
    %167 = vector.extract_strided_slice %7 {offsets = [0, 0], sizes = [1, 256], strides = [1, 1]} : vector<9x256xf32> to vector<1x256xf32>
    %c17_i32_67 = arith.constant 17 : i32
    %168 = tpu.dynamic_rotate %165 by %c17_i32_67 dim 1 : vector<1x256xf32>, i32 -> vector<1x256xf32>
    %169 = arith.mulf %167, %168 : vector<1x256xf32>
    %170 = vector.extract_strided_slice %7 {offsets = [1, 0], sizes = [1, 256], strides = [1, 1]} : vector<9x256xf32> to vector<1x256xf32>
    %c16_i32_68 = arith.constant 16 : i32
    %171 = tpu.dynamic_rotate %165 by %c16_i32_68 dim 1 : vector<1x256xf32>, i32 -> vector<1x256xf32>
    %172 = arith.mulf %170, %171 : vector<1x256xf32>
    %173 = vector.extract_strided_slice %7 {offsets = [2, 0], sizes = [1, 256], strides = [1, 1]} : vector<9x256xf32> to vector<1x256xf32>
    %c15_i32_69 = arith.constant 15 : i32
    %174 = tpu.dynamic_rotate %165 by %c15_i32_69 dim 1 : vector<1x256xf32>, i32 -> vector<1x256xf32>
    %175 = arith.mulf %173, %174 : vector<1x256xf32>
    %176 = vector.extract_strided_slice %7 {offsets = [3, 0], sizes = [1, 256], strides = [1, 1]} : vector<9x256xf32> to vector<1x256xf32>
    %c1_i32_70 = arith.constant 1 : i32
    %177 = tpu.dynamic_rotate %165 by %c1_i32_70 dim 1 : vector<1x256xf32>, i32 -> vector<1x256xf32>
    %178 = arith.mulf %176, %177 : vector<1x256xf32>
    %179 = vector.extract_strided_slice %7 {offsets = [5, 0], sizes = [1, 256], strides = [1, 1]} : vector<9x256xf32> to vector<1x256xf32>
    %c255_i32_71 = arith.constant 255 : i32
    %180 = tpu.dynamic_rotate %165 by %c255_i32_71 dim 1 : vector<1x256xf32>, i32 -> vector<1x256xf32>
    %181 = arith.mulf %179, %180 : vector<1x256xf32>
    %182 = vector.extract_strided_slice %7 {offsets = [6, 0], sizes = [1, 256], strides = [1, 1]} : vector<9x256xf32> to vector<1x256xf32>
    %c241_i32_72 = arith.constant 241 : i32
    %183 = tpu.dynamic_rotate %165 by %c241_i32_72 dim 1 : vector<1x256xf32>, i32 -> vector<1x256xf32>
    %184 = arith.mulf %182, %183 : vector<1x256xf32>
    %185 = vector.extract_strided_slice %7 {offsets = [7, 0], sizes = [1, 256], strides = [1, 1]} : vector<9x256xf32> to vector<1x256xf32>
    %c240_i32_73 = arith.constant 240 : i32
    %186 = tpu.dynamic_rotate %165 by %c240_i32_73 dim 1 : vector<1x256xf32>, i32 -> vector<1x256xf32>
    %187 = arith.mulf %185, %186 : vector<1x256xf32>
    %188 = vector.extract_strided_slice %7 {offsets = [8, 0], sizes = [1, 256], strides = [1, 1]} : vector<9x256xf32> to vector<1x256xf32>
    %c239_i32_74 = arith.constant 239 : i32
    %189 = tpu.dynamic_rotate %165 by %c239_i32_74 dim 1 : vector<1x256xf32>, i32 -> vector<1x256xf32>
    %190 = arith.mulf %188, %189 : vector<1x256xf32>
    %191 = tpu.concatenate %169, %172, %175, %178, %165, %181, %184, %187, %190 in 0 : vector<1x256xf32>, vector<1x256xf32>, vector<1x256xf32>, vector<1x256xf32>, vector<1x256xf32>, vector<1x256xf32>, vector<1x256xf32>, vector<1x256xf32>, vector<1x256xf32> -> vector<9x256xf32>
    %cst_75 = arith.constant dense<0.000000e+00> : vector<1x256xf32>
    %192 = tpu.matmul %166, %191, %cst_75 {dimension_numbers = #tpu.dot_dimension_numbers<[1], [0], [0], [1], [0, 0, 1, 1], [], []>} : vector<1x9xf32>, vector<9x256xf32>, vector<1x256xf32> -> vector<1x256xf32>
    %c0_76 = arith.constant 0 : index
    %c0_77 = arith.constant 0 : index
    %193 = vector.load %arg21[%c0_76, %c0_77] : memref<1x1xf32, #tpu.memory_space<vmem>>, vector<1x1xf32>
    %194 = vector.broadcast %193 : vector<1x1xf32> to vector<1x256xf32>
    %195 = arith.addf %192, %194 : vector<1x256xf32>
    %196 = arith.negf %195 : vector<1x256xf32>
    %197 = math.exp %196 : vector<1x256xf32>
    %cst_78 = arith.constant 1.000000e+00 : f32
    %198 = vector.broadcast %cst_78 : f32 to vector<1x256xf32>
    %199 = arith.addf %198, %197 : vector<1x256xf32>
    %200 = arith.divf %198, %199 : vector<1x256xf32>
    %c0_79 = arith.constant 0 : index
    %c0_80 = arith.constant 0 : index
    %201 = vector.load %arg24[%c0_79, %c0_80] : memref<256x64xf32, #tpu.memory_space<vmem>>, vector<256x64xf32>
    %cst_81 = arith.constant dense<0.000000e+00> : vector<1x64xf32>
    %202 = tpu.matmul %200, %201, %cst_81 {dimension_numbers = #tpu.dot_dimension_numbers<[1], [0], [0], [1], [0, 0, 1, 1], [], []>} : vector<1x256xf32>, vector<256x64xf32>, vector<1x64xf32> -> vector<1x64xf32>
    %203 = vector.broadcast %202 : vector<1x64xf32> to vector<4x64xf32>
    %204 = arith.mulf %3, %203 : vector<4x64xf32>
    %cst_82 = arith.constant 0.000000e+00 : f32
    %205 = vector.broadcast %cst_82 : f32 to vector<4x64xf32>
    %c0_83 = arith.constant 0 : index
    %206 = memref.load %arg23[%c0_83] : memref<1xf32, #tpu.memory_space<smem>>
    %207 = vector.broadcast %206 : f32 to vector<4x64xf32>
    %208 = arith.addf %205, %207 : vector<4x64xf32>
    %c0_84 = arith.constant 0 : index
    %209 = memref.load %arg22[%c0_84] : memref<9xf32, #tpu.memory_space<smem>>
    %210 = vector.extract_strided_slice %6 {offsets = [0, 0], sizes = [1, 64], strides = [1, 1]} : vector<9x64xf32> to vector<1x64xf32>
    %c9_i32_85 = arith.constant 9 : i32
    %211 = tpu.dynamic_rotate %204 by %c9_i32_85 dim 1 : vector<4x64xf32>, i32 -> vector<4x64xf32>
    %212 = vector.broadcast %210 : vector<1x64xf32> to vector<4x64xf32>
    %213 = arith.mulf %212, %211 : vector<4x64xf32>
    %214 = vector.broadcast %209 : f32 to vector<4x64xf32>
    %215 = arith.mulf %214, %213 : vector<4x64xf32>
    %216 = arith.addf %208, %215 : vector<4x64xf32>
    %c1 = arith.constant 1 : index
    %217 = memref.load %arg22[%c1] : memref<9xf32, #tpu.memory_space<smem>>
    %218 = vector.extract_strided_slice %6 {offsets = [1, 0], sizes = [1, 64], strides = [1, 1]} : vector<9x64xf32> to vector<1x64xf32>
    %c8_i32_86 = arith.constant 8 : i32
    %219 = tpu.dynamic_rotate %204 by %c8_i32_86 dim 1 : vector<4x64xf32>, i32 -> vector<4x64xf32>
    %220 = vector.broadcast %218 : vector<1x64xf32> to vector<4x64xf32>
    %221 = arith.mulf %220, %219 : vector<4x64xf32>
    %222 = vector.broadcast %217 : f32 to vector<4x64xf32>
    %223 = arith.mulf %222, %221 : vector<4x64xf32>
    %224 = arith.addf %216, %223 : vector<4x64xf32>
    %c2 = arith.constant 2 : index
    %225 = memref.load %arg22[%c2] : memref<9xf32, #tpu.memory_space<smem>>
    %226 = vector.extract_strided_slice %6 {offsets = [2, 0], sizes = [1, 64], strides = [1, 1]} : vector<9x64xf32> to vector<1x64xf32>
    %c7_i32_87 = arith.constant 7 : i32
    %227 = tpu.dynamic_rotate %204 by %c7_i32_87 dim 1 : vector<4x64xf32>, i32 -> vector<4x64xf32>
    %228 = vector.broadcast %226 : vector<1x64xf32> to vector<4x64xf32>
    %229 = arith.mulf %228, %227 : vector<4x64xf32>
    %230 = vector.broadcast %225 : f32 to vector<4x64xf32>
    %231 = arith.mulf %230, %229 : vector<4x64xf32>
    %232 = arith.addf %224, %231 : vector<4x64xf32>
    %c3 = arith.constant 3 : index
    %233 = memref.load %arg22[%c3] : memref<9xf32, #tpu.memory_space<smem>>
    %234 = vector.extract_strided_slice %6 {offsets = [3, 0], sizes = [1, 64], strides = [1, 1]} : vector<9x64xf32> to vector<1x64xf32>
    %c1_i32_88 = arith.constant 1 : i32
    %235 = tpu.dynamic_rotate %204 by %c1_i32_88 dim 1 : vector<4x64xf32>, i32 -> vector<4x64xf32>
    %236 = vector.broadcast %234 : vector<1x64xf32> to vector<4x64xf32>
    %237 = arith.mulf %236, %235 : vector<4x64xf32>
    %238 = vector.broadcast %233 : f32 to vector<4x64xf32>
    %239 = arith.mulf %238, %237 : vector<4x64xf32>
    %240 = arith.addf %232, %239 : vector<4x64xf32>
    %c4 = arith.constant 4 : index
    %241 = memref.load %arg22[%c4] : memref<9xf32, #tpu.memory_space<smem>>
    %242 = vector.broadcast %241 : f32 to vector<4x64xf32>
    %243 = arith.mulf %242, %204 : vector<4x64xf32>
    %244 = arith.addf %240, %243 : vector<4x64xf32>
    %c5 = arith.constant 5 : index
    %245 = memref.load %arg22[%c5] : memref<9xf32, #tpu.memory_space<smem>>
    %246 = vector.extract_strided_slice %6 {offsets = [5, 0], sizes = [1, 64], strides = [1, 1]} : vector<9x64xf32> to vector<1x64xf32>
    %c63_i32_89 = arith.constant 63 : i32
    %247 = tpu.dynamic_rotate %204 by %c63_i32_89 dim 1 : vector<4x64xf32>, i32 -> vector<4x64xf32>
    %248 = vector.broadcast %246 : vector<1x64xf32> to vector<4x64xf32>
    %249 = arith.mulf %248, %247 : vector<4x64xf32>
    %250 = vector.broadcast %245 : f32 to vector<4x64xf32>
    %251 = arith.mulf %250, %249 : vector<4x64xf32>
    %252 = arith.addf %244, %251 : vector<4x64xf32>
    %c6 = arith.constant 6 : index
    %253 = memref.load %arg22[%c6] : memref<9xf32, #tpu.memory_space<smem>>
    %254 = vector.extract_strided_slice %6 {offsets = [6, 0], sizes = [1, 64], strides = [1, 1]} : vector<9x64xf32> to vector<1x64xf32>
    %c57_i32_90 = arith.constant 57 : i32
    %255 = tpu.dynamic_rotate %204 by %c57_i32_90 dim 1 : vector<4x64xf32>, i32 -> vector<4x64xf32>
    %256 = vector.broadcast %254 : vector<1x64xf32> to vector<4x64xf32>
    %257 = arith.mulf %256, %255 : vector<4x64xf32>
    %258 = vector.broadcast %253 : f32 to vector<4x64xf32>
    %259 = arith.mulf %258, %257 : vector<4x64xf32>
    %260 = arith.addf %252, %259 : vector<4x64xf32>
    %c7 = arith.constant 7 : index
    %261 = memref.load %arg22[%c7] : memref<9xf32, #tpu.memory_space<smem>>
    %262 = vector.extract_strided_slice %6 {offsets = [7, 0], sizes = [1, 64], strides = [1, 1]} : vector<9x64xf32> to vector<1x64xf32>
    %c56_i32_91 = arith.constant 56 : i32
    %263 = tpu.dynamic_rotate %204 by %c56_i32_91 dim 1 : vector<4x64xf32>, i32 -> vector<4x64xf32>
    %264 = vector.broadcast %262 : vector<1x64xf32> to vector<4x64xf32>
    %265 = arith.mulf %264, %263 : vector<4x64xf32>
    %266 = vector.broadcast %261 : f32 to vector<4x64xf32>
    %267 = arith.mulf %266, %265 : vector<4x64xf32>
    %268 = arith.addf %260, %267 : vector<4x64xf32>
    %c8 = arith.constant 8 : index
    %269 = memref.load %arg22[%c8] : memref<9xf32, #tpu.memory_space<smem>>
    %270 = vector.extract_strided_slice %6 {offsets = [8, 0], sizes = [1, 64], strides = [1, 1]} : vector<9x64xf32> to vector<1x64xf32>
    %c55_i32_92 = arith.constant 55 : i32
    %271 = tpu.dynamic_rotate %204 by %c55_i32_92 dim 1 : vector<4x64xf32>, i32 -> vector<4x64xf32>
    %272 = vector.broadcast %270 : vector<1x64xf32> to vector<4x64xf32>
    %273 = arith.mulf %272, %271 : vector<4x64xf32>
    %274 = vector.broadcast %269 : f32 to vector<4x64xf32>
    %275 = arith.mulf %274, %273 : vector<4x64xf32>
    %276 = arith.addf %268, %275 : vector<4x64xf32>
    %277 = tpu.concatenate %276, %3 in 0 : vector<4x64xf32>, vector<4x64xf32> -> vector<8x64xf32>
    %c0_93 = arith.constant 0 : index
    %c0_94 = arith.constant 0 : index
    %278 = vector.load %arg25[%c0_93, %c0_94] : memref<64x256xf32, #tpu.memory_space<vmem>>, vector<64x256xf32>
    %cst_95 = arith.constant dense<0.000000e+00> : vector<8x256xf32>
    %279 = tpu.matmul %277, %278, %cst_95 {dimension_numbers = #tpu.dot_dimension_numbers<[1], [0], [0], [1], [0, 0, 1, 1], [], []>} : vector<8x64xf32>, vector<64x256xf32>, vector<8x256xf32> -> vector<8x256xf32>
    %280 = vector.extract_strided_slice %279 {offsets = [0, 0], sizes = [4, 256], strides = [1, 1]} : vector<8x256xf32> to vector<4x256xf32>
    %cst_96 = arith.constant 0.000000e+00 : f32
    %281 = vector.broadcast %cst_96 : f32 to vector<4x256xf32>
    %282 = arith.maximumf %280, %281 : vector<4x256xf32>
    %283 = vector.extract_strided_slice %279 {offsets = [4, 0], sizes = [4, 256], strides = [1, 1]} : vector<8x256xf32> to vector<4x256xf32>
    %284 = vector.extract_strided_slice %7 {offsets = [1, 0], sizes = [1, 256], strides = [1, 1]} : vector<9x256xf32> to vector<1x256xf32>
    %c16_i32_97 = arith.constant 16 : i32
    %285 = tpu.dynamic_rotate %282 by %c16_i32_97 dim 1 : vector<4x256xf32>, i32 -> vector<4x256xf32>
    %286 = vector.broadcast %284 : vector<1x256xf32> to vector<4x256xf32>
    %287 = arith.mulf %286, %285 : vector<4x256xf32>
    %288 = arith.addf %282, %287 : vector<4x256xf32>
    %289 = vector.extract_strided_slice %7 {offsets = [7, 0], sizes = [1, 256], strides = [1, 1]} : vector<9x256xf32> to vector<1x256xf32>
    %c240_i32_98 = arith.constant 240 : i32
    %290 = tpu.dynamic_rotate %282 by %c240_i32_98 dim 1 : vector<4x256xf32>, i32 -> vector<4x256xf32>
    %291 = vector.broadcast %289 : vector<1x256xf32> to vector<4x256xf32>
    %292 = arith.mulf %291, %290 : vector<4x256xf32>
    %293 = arith.addf %288, %292 : vector<4x256xf32>
    %294 = vector.extract_strided_slice %7 {offsets = [3, 0], sizes = [1, 256], strides = [1, 1]} : vector<9x256xf32> to vector<1x256xf32>
    %c1_i32_99 = arith.constant 1 : i32
    %295 = tpu.dynamic_rotate %293 by %c1_i32_99 dim 1 : vector<4x256xf32>, i32 -> vector<4x256xf32>
    %296 = vector.broadcast %294 : vector<1x256xf32> to vector<4x256xf32>
    %297 = arith.mulf %296, %295 : vector<4x256xf32>
    %298 = arith.addf %293, %297 : vector<4x256xf32>
    %299 = vector.extract_strided_slice %7 {offsets = [5, 0], sizes = [1, 256], strides = [1, 1]} : vector<9x256xf32> to vector<1x256xf32>
    %c255_i32_100 = arith.constant 255 : i32
    %300 = tpu.dynamic_rotate %293 by %c255_i32_100 dim 1 : vector<4x256xf32>, i32 -> vector<4x256xf32>
    %301 = vector.broadcast %299 : vector<1x256xf32> to vector<4x256xf32>
    %302 = arith.mulf %301, %300 : vector<4x256xf32>
    %303 = arith.addf %298, %302 : vector<4x256xf32>
    %cst_101 = arith.constant 0.111111112 : f32
    %304 = vector.broadcast %cst_101 : f32 to vector<4x256xf32>
    %305 = arith.mulf %303, %304 : vector<4x256xf32>
    %306 = vector.broadcast %200 : vector<1x256xf32> to vector<4x256xf32>
    %307 = arith.mulf %305, %306 : vector<4x256xf32>
    %308 = arith.addf %307, %283 : vector<4x256xf32>
    %309 = arith.subf %308, %5 : vector<4x256xf32>
    %c0_102 = arith.constant 0 : index
    %c0_103 = arith.constant 0 : index
    %c0_104 = arith.constant 0 : index
    %310 = vector.load %arg27[%c0_102, %c0_103, %c0_104] : memref<1x4x256xf32, #tpu.memory_space<vmem>>, vector<1x4x256xf32>
    %311 = vector.shape_cast %310 : vector<1x4x256xf32> to vector<4x256xf32>
    %312 = vector.shape_cast %309 : vector<4x256xf32> to vector<1x4x256xf32>
    tpu.vector_store %arg27[%c0_102, %c0_103, %c0_104], %312 {strides = array<i32>} : memref<1x4x256xf32, #tpu.memory_space<vmem>>, vector<1x4x256xf32>,
    return
  }
  func.func @transform_0(%arg0: i32) -> (i32, i32, i32) {
    %c0_i32 = arith.constant 0 : i32
    %c0_i32_0 = arith.constant 0 : i32
    %c0_i32_1 = arith.constant 0 : i32
    return %arg0, %c0_i32, %c0_i32_0 : i32, i32, i32
  }
  func.func @transform_1(%arg0: i32) -> (i32, i32, i32) {
    %c0_i32 = arith.constant 0 : i32
    %c0_i32_0 = arith.constant 0 : i32
    %c0_i32_1 = arith.constant 0 : i32
    return %arg0, %c0_i32, %c0_i32_0 : i32, i32, i32
  }
  func.func @transform_2(%arg0: i32) -> (i32, i32, i32) {
    %c0_i32 = arith.constant 0 : i32
    %c0_i32_0 = arith.constant 0 : i32
    %c0_i32_1 = arith.constant 0 : i32
    return %arg0, %c0_i32, %c0_i32_0 : i32, i32, i32
  }
  func.func @transform_3(%arg0: i32) -> (i32, i32) {
    %c0_i32 = arith.constant 0 : i32
    %c0_i32_0 = arith.constant 0 : i32
    %c0_i32_1 = arith.constant 0 : i32
    return %c0_i32, %c0_i32_0 : i32, i32
  }
  func.func @transform_4(%arg0: i32) -> (i32, i32) {
    %c0_i32 = arith.constant 0 : i32
    %c0_i32_0 = arith.constant 0 : i32
    %c0_i32_1 = arith.constant 0 : i32
    return %c0_i32, %c0_i32_0 : i32, i32
  }
  func.func @transform_5(%arg0: i32) -> (i32, i32) {
    %c0_i32 = arith.constant 0 : i32
    %c0_i32_0 = arith.constant 0 : i32
    %c0_i32_1 = arith.constant 0 : i32
    return %c0_i32, %c0_i32_0 : i32, i32
  }
  func.func @transform_6(%arg0: i32) -> (i32, i32) {
    %c0_i32 = arith.constant 0 : i32
    %c0_i32_0 = arith.constant 0 : i32
    %c0_i32_1 = arith.constant 0 : i32
    return %c0_i32, %c0_i32_0 : i32, i32
  }
  func.func @transform_7(%arg0: i32) -> (i32, i32) {
    %c0_i32 = arith.constant 0 : i32
    %c0_i32_0 = arith.constant 0 : i32
    %c0_i32_1 = arith.constant 0 : i32
    return %c0_i32, %c0_i32_0 : i32, i32
  }
  func.func @transform_8(%arg0: i32) -> (i32, i32) {
    %c0_i32 = arith.constant 0 : i32
    %c0_i32_0 = arith.constant 0 : i32
    %c0_i32_1 = arith.constant 0 : i32
    return %c0_i32, %c0_i32_0 : i32, i32
  }
  func.func @transform_9(%arg0: i32) -> (i32, i32) {
    %c0_i32 = arith.constant 0 : i32
    %c0_i32_0 = arith.constant 0 : i32
    %c0_i32_1 = arith.constant 0 : i32
    return %c0_i32, %c0_i32_0 : i32, i32
  }
  func.func @transform_10(%arg0: i32) -> (i32, i32) {
    %c0_i32 = arith.constant 0 : i32
    %c0_i32_0 = arith.constant 0 : i32
    %c0_i32_1 = arith.constant 0 : i32
    return %c0_i32, %c0_i32_0 : i32, i32
  }
  func.func @transform_11(%arg0: i32) -> (i32, i32) {
    %c0_i32 = arith.constant 0 : i32
    %c0_i32_0 = arith.constant 0 : i32
    %c0_i32_1 = arith.constant 0 : i32
    return %c0_i32, %c0_i32_0 : i32, i32
  }
  func.func @transform_12(%arg0: i32) -> (i32, i32) {
    %c0_i32 = arith.constant 0 : i32
    %c0_i32_0 = arith.constant 0 : i32
    %c0_i32_1 = arith.constant 0 : i32
    return %c0_i32, %c0_i32_0 : i32, i32
  }
  func.func @transform_13(%arg0: i32) -> (i32, i32) {
    %c0_i32 = arith.constant 0 : i32
    %c0_i32_0 = arith.constant 0 : i32
    %c0_i32_1 = arith.constant 0 : i32
    return %c0_i32, %c0_i32_0 : i32, i32
  }
  func.func @transform_14(%arg0: i32) -> (i32, i32) {
    %c0_i32 = arith.constant 0 : i32
    %c0_i32_0 = arith.constant 0 : i32
    %c0_i32_1 = arith.constant 0 : i32
    return %c0_i32, %c0_i32_0 : i32, i32
  }
  func.func @transform_15(%arg0: i32) -> (i32, i32) {
    %c0_i32 = arith.constant 0 : i32
    %c0_i32_0 = arith.constant 0 : i32
    %c0_i32_1 = arith.constant 0 : i32
    return %c0_i32, %c0_i32_0 : i32, i32
  }
  func.func @transform_16(%arg0: i32) -> (i32, i32) {
    %c0_i32 = arith.constant 0 : i32
    %c0_i32_0 = arith.constant 0 : i32
    %c0_i32_1 = arith.constant 0 : i32
    return %c0_i32, %c0_i32_0 : i32, i32
  }
  func.func @transform_17(%arg0: i32) -> (i32, i32) {
    %c0_i32 = arith.constant 0 : i32
    %c0_i32_0 = arith.constant 0 : i32
    %c0_i32_1 = arith.constant 0 : i32
    return %c0_i32, %c0_i32_0 : i32, i32
  }
  func.func @transform_18(%arg0: i32) -> (i32, i32) {
    %c0_i32 = arith.constant 0 : i32
    %c0_i32_0 = arith.constant 0 : i32
    %c0_i32_1 = arith.constant 0 : i32
    return %c0_i32, %c0_i32_0 : i32, i32
  }
  func.func @transform_19(%arg0: i32) -> (i32, i32) {
    %c0_i32 = arith.constant 0 : i32
    %c0_i32_0 = arith.constant 0 : i32
    %c0_i32_1 = arith.constant 0 : i32
    return %c0_i32, %c0_i32_0 : i32, i32
  }
  func.func @transform_20(%arg0: i32) -> (i32, i32) {
    %c0_i32 = arith.constant 0 : i32
    %c0_i32_0 = arith.constant 0 : i32
    %c0_i32_1 = arith.constant 0 : i32
    return %c0_i32, %c0_i32_0 : i32, i32
  }
  func.func @transform_21(%arg0: i32) -> i32 {
    %c0_i32 = arith.constant 0 : i32
    %c0_i32_0 = arith.constant 0 : i32
    return %c0_i32 : i32
  }
  func.func @transform_22(%arg0: i32) -> i32 {
    %c0_i32 = arith.constant 0 : i32
    %c0_i32_0 = arith.constant 0 : i32
    return %c0_i32 : i32
  }
  func.func @transform_23(%arg0: i32) -> (i32, i32) {
    %c0_i32 = arith.constant 0 : i32
    %c0_i32_0 = arith.constant 0 : i32
    %c0_i32_1 = arith.constant 0 : i32
    return %c0_i32, %c0_i32_0 : i32, i32
  }
  func.func @transform_24(%arg0: i32) -> (i32, i32) {
    %c0_i32 = arith.constant 0 : i32
    %c0_i32_0 = arith.constant 0 : i32
    %c0_i32_1 = arith.constant 0 : i32
    return %c0_i32, %c0_i32_0 : i32, i32
  }
  func.func @transform_25(%arg0: i32) -> (i32, i32, i32) {
    %c0_i32 = arith.constant 0 : i32
    %c0_i32_0 = arith.constant 0 : i32
    %c0_i32_1 = arith.constant 0 : i32
    return %arg0, %c0_i32, %c0_i32_0 : i32, i32, i32
  }
  func.func @transform_26(%arg0: i32) -> (i32, i32, i32) {
    %c0_i32 = arith.constant 0 : i32
    %c0_i32_0 = arith.constant 0 : i32
    %c0_i32_1 = arith.constant 0 : i32
    return %arg0, %c0_i32, %c0_i32_0 : i32, i32, i32
  }
}

</mosaic_0001>

<bundles_post_ra>
// kernel: dfterm_err_forward.1
= control target key start
LH: loop header
LB: loop body
LE: loop exit
PB: predicated region body
PF: predicated region fallthrough
CT: control target
= control target key end

     0   :  { %s3695_s0 = inlined_call_operand.vmem [shape: f32[2,8,64], index: 0, kind: input, shape index: {}]   ;;  %s3696_s1 = inlined_call_operand.vmem [shape: f32[2,4,64], index: 1, kind: input, shape index: {}]   ;;  %s3697_s2 = inlined_call_operand.vmem [shape: f32[2,4,256], index: 2, kind: input, shape index: {}]   ;;  %s3698_s3 = inlined_call_operand.vmem [shape: f32[9,64], index: 3, kind: input, shape index: {}]   ;;  %s3699_s4 = inlined_call_operand.vmem [shape: f32[9,256], index: 4, kind: input, shape index: {}]   ;;  %s3700_s5 = inlined_call_operand.vmem [shape: f32[8,72], index: 5, kind: input, shape index: {}]   ;;  %s3701_s6 = inlined_call_operand.vmem [shape: f32[8,1], index: 6, kind: input, shape index: {}]   ;;  %s3702_s7 = inlined_call_operand.vmem [shape: f32[8,8], index: 7, kind: input, shape index: {}]   ;;  %s3703_s8 = inlined_call_operand.vmem [shape: f32[8,1], index: 8, kind: input, shape index: {}]   ;;  %s3704_s9 = inlined_call_operand.vmem [shape: f32[4,8], index: 9, kind: input, shape index: {}]   ;;  %s3705_s10 = inlined_call_operand.vmem [shape: f32[4,1], index: 10, kind: input, shape index: {}]   ;;  %s3706_s11 = inlined_call_operand.vmem [shape: f32[8,4], index: 11, kind: input, shape index: {}]   ;;  %s3707_s12 = inlined_call_operand.vmem [shape: f32[8,1], index: 12, kind: input, shape index: {}]   ;;  %s3708_s13 = inlined_call_operand.vmem [shape: f32[8,72], index: 13, kind: input, shape index: {}]   ;;  %s3709_s14 = inlined_call_operand.vmem [shape: f32[8,1], index: 14, kind: input, shape index: {}]   ;;  %s3710_s15 = inlined_call_operand.vmem [shape: f32[8,4], index: 15, kind: input, shape index: {}]   ;;  %s3711_s16 = inlined_call_operand.vmem [shape: f32[8,1], index: 16, kind: input, shape index: {}]   ;;  %s3712_s17 = inlined_call_operand.vmem [shape: f32[1,36], index: 17, kind: input, shape index: {}]   ;;  %s3713_s18 = inlined_call_operand.<no memory space> [shape: f32[1,1], index: 18, kind: input, shape index: {}]   ;;  %s3714_s19 = inlined_call_operand.vmem [shape: f32[1,9], index: 19, kind: input, shape index: {}]   ;;  %s3715_s21 = inlined_call_operand.vmem [shape: f32[9], index: 21, kind: input, shape index: {}]   ;;  %s3716_s22 = inlined_call_operand.<no memory space> [shape: f32[1], index: 22, kind: input, shape index: {}]   ;;  %s3717_s23 = inlined_call_operand.vmem [shape: f32[256,64], index: 23, kind: input, shape index: {}]   ;;  %s3718_s24 = inlined_call_operand.vmem [shape: f32[64,256], index: 24, kind: input, shape index: {}]   ;;  %s3719_s25 = inlined_call_operand.vmem [shape: f32[2,8,64], index: 25, kind: output, shape index: {0}]   ;;  %s3720_s26 = inlined_call_operand.vmem [shape: f32[2,4,256], index: 26, kind: output, shape index: {1}]   ;;  %s3721_s20 = inlined_call_operand.<no memory space> [shape: f32[1,1], index: 20, kind: input, shape index: {}]  }
   0x1   :  { %3756 = sst [smem:[#allocation8_spill]] %s3695_s0  ;;  %v32_v0 = vstv %s3713_s18  ;;  %v34_v1 = vstv %s3721_s20 }
   0x2   :  { %3757 = sst [smem:[#allocation9_spill]] %s3696_s1  ;;  %33 = vst [vmem:[#allocation2] sm:$0x1] %v32_v0  ;;  %35 = vst [vmem:[#allocation3] sm:$0x1] %v34_v1 }
   0x3   :  { %3758 = sst [smem:[#allocation10_spill]] %s3697_s2 }
   0x4   :  { %3759 = sst [smem:[#allocation11_spill]] %s3698_s3 }
   0x5   :  { %3760 = sst [smem:[#allocation12_spill]] %s3699_s4 }
   0x6   :  { %3761 = sst [smem:[#allocation13_spill]] %s3700_s5 }
   0x7   :  { %3762 = sst [smem:[#allocation14_spill]] %s3701_s6 }
   0x8   :  { %3763 = sst [smem:[#allocation15_spill]] %s3702_s7 }
   0x9   :  { %3764 = sst [smem:[#allocation16_spill]] %s3703_s8 }
   0xa   :  { %3765 = sst [smem:[#allocation17_spill]] %s3704_s9 }
   0xb   :  { %3766 = sst [smem:[#allocation18_spill]] %s3705_s10 }
   0xc   :  { %3767 = sst [smem:[#allocation19_spill]] %s3706_s11 }
   0xd   :  { %3768 = sst [smem:[#allocation20_spill]] %s3707_s12 }
   0xe   :  { %3769 = sst [smem:[#allocation21_spill]] %s3708_s13 }
   0xf   :  { %3770 = sst [smem:[#allocation22_spill]] %s3710_s15 }
  0x10   :  { %3771 = sst [smem:[#allocation23_spill]] %s3712_s17 }
  0x11   :  { %3772 = sst [smem:[#allocation24_spill]] %s3714_s19 }
  0x12   :  { %3773 = sst [smem:[#allocation25_spill]] %s3715_s21 }
  0x13   :  { %36 = sst [smem:[#allocation4]] %s3716_s22 }
  0x14   :  { %37 = vsyncpa [#allocation6], 0  ;;  %s2958_s29 = smov 0  }
  0x15 LB: > { %s2451_s18 = sadd.s32 4294967295, %s2790_s29   ;;  %p2453_p0 = scmp.ge.s32.totalorder %s2790_s29, 1  ;;  %s2790_s29 = sphi %s2958_s29, %s43_s29  }
  0x16   : > { %p640_p1 = scmp.lt.s32.totalorder %s2790_s29, 3  ;;  %s3774_s21 = sld [smem:[#allocation25_spill]] }
  0x17   : > { %p2715_p3 = scmp.eq.s32.totalorder %s2451_s18, 0 }
  0x18   : > { %p2969_p2 = pnand %p2453_p0, %p640_p1 }
  0x1a   : > { %p2711_p4 = pneg %p2969_p2 }
  0x1c   : > { %s707_s22 = sshll.u32 %s3774_s21, 4  ;;  %p2712_p5 = pnand %p2715_p3, %p2711_p4  ;;  %s708_s22 = int_to_ptr.vmem [resolvable:$true] %s707_s22 }
  0x1d   : > { %s2765_s30 = scalar_lea.vmem %s708_s22, 16  ;;  %p2773_p10 = scmp.lt.s32.totalorder %s708_s22, %s708_s22 }
  0x1e   : > { %p2766_p6 = scmp.ne.s32.totalorder %s708_s22, %s2765_s30  ;;  %p2767_p7 = pneg %p2712_p5 }
  0x1f   : > { %p2774_p11 = scmp.lt.s32.totalorder %s2765_s30, %s2765_s30 }
  0x20   : > { %p2768_p8 = pnand %p2767_p7, %p2766_p6 }
  0x21   : > { %p2775_p12 = por %p2774_p11, %p2773_p10 }
  0x22   : > { %p2769_p9 = pneg %p2768_p8 }
  0x24   : > { %p2776_p13 = pnand %p2775_p12, %p2769_p9 }
  0x26   : > { %2779 = shalt.err (!%p2776_p13)
}
  0x27   : > { %s2792_s2 = smov [#allocation5]   ;;  %751 = sbr.rel (%p2969_p2) target bundleno = 3662 (0xe4e), region = 120 }
  0x28   : > { %2714 = dma.vmem_to_smem (!%p2712_p5), %s708_s22, 16, %s2792_s2, [#allocation6]  }
  0x2e   : > { %2785 = dma.done.wait (%p2715_p3), [#allocation6], 16  }
  0x2f   : > { %2787 = vsyncadd (%p2715_p3), [#allocation6], 4294967280 }
  0x30   : > { %757 = sfence }
  0x31   : > { %p834_p0 = scmp.lt.s32.totalorder %s2451_s18, 1  ;;  %s3776_s1 = sld [smem:[#allocation8_spill]]  ;;  %vm866_vm0 = vcmask 1048064   ;;  %v2794_v5 = vmov 0.0|0.0   ;;  %v2801_v8 = vmov 0.0   ;;  %vm2802_vm1 = vmmov 0  }
  0x32   : > { %s3736_s3 = smov 64   ;;  %2621 = vmatprep.subr.bf16.mxu0 %v2794_v5  ;;  %s3730_s7 = smov 71   ;;  %2580 = vmatprep.subr.mxu1 %v2801_v8  ;;  %v2804_v10 = vmov 0   ;;  %v873_v11 = vlaneseq  ;;  %vm944_vm2 = vcmask 588800   ;;  %vm1019_vm3 = vcmask 523264  }
  0x33   : > { %s3810_s18 = smov (!%p834_p0, %s2451_s18), 1  ;;  %s3740_s28 = smov 73   ;;  %2577 = vmatprep.mubr.msk.f32.mxu0 %vm2802_vm1, %v2801_v8  ;;  %2582 = vmatprep.mubr.msk.f32.mxu1 %vm2802_vm1, %v2801_v8  ;;  %vm1026_vm4 = vcmask 64512   ;;  %vm1198_vm5 = vcmask 1043456   ;;  %vm1194_vm6 = vcmask 31744   ;;  %vm1669_vm15 = vcmask 293888  }
  0x34   : > { %s2983_s5 = sshll.u32 %s3810_s18, 3  ;;  %s3738_s8 = smov 127   ;;  %2747 = vset.pattern.permute.xlu0 %v2804_v10  ;;  %2748 = vset.pattern.permute.xlu1 %v2804_v10  ;;  %v874_v12 = vshrl.u32 %v873_v11, 7 }
  0x35   : > { %s3734_s4 = smov 72   ;;  %s3724_s20 = smov 120  }
  0x36   : > { %s3728_s0 = smov 65   ;;  %s3726_s22 = smov 121   ;;  %v3019_v13 = vsub.s32 0, %v874_v12  ;;  %v3021_v14 = vsub.s32 1, %v874_v12  ;;  %v3026_v17 = vsub.s32 2, %v874_v12  ;;  %v3034_v20 = vsub.s32 3, %v874_v12 }
  0x37   : > { %s2989_s27 = scalar_lea.vmem %s3776_s1, %s2983_s5  ;;  %s3777_s2 = sld [smem:[#allocation14_spill]]  ;;  %v3036_v22 = vsub.s32 5, %v874_v12  ;;  %v3049_v30 = vsub.s32 6, %v874_v12  ;;  %v3052_v34 = vsub.s32 7, %v874_v12 }
  0x38   : > { %v2992_v2 = vld [vmem:[%s2989_s27] sm:$0xff]  ;;  %s3732_s10 = smov 119   ;;  %s3779_s1 = sld [smem:[#allocation13_spill]] }
  0x39   : > { %867 = vrot.lane.b32.xlu0 %v2992_v2, %s3736_s3  ;;  %s3784_s30 = sld [smem:[#allocation9_spill]]  ;;  %s3785_s12 = sld [smem:[#allocation20_spill]] }
  0x3a   : > { %s3786_s11 = sld [smem:[#allocation19_spill]]  ;;  %s3747_s6 = smov 1  }
  0x3b   : > { %s3751_s9 = smov 15   ;;  %s3795_s13 = sld [smem:[#allocation21_spill]] }
  0x3c   : > { %s3796_s17 = sld [smem:[#allocation23_spill]]  ;;  %s3805_s15 = sld [smem:[#allocation22_spill]] }
  0x3d   : > { %v938_v9 = vld [vmem:[%s3777_s2] sm:$0xff]  ;;  %s3780_s2 = sld [smem:[#allocation15_spill]]  ;;  %s3806_s19 = sld [smem:[#allocation24_spill]] }
  0x3e   : > { %v865_v49 = vld [vmem:[%s3779_s1] sm:$0xff]  ;;  %s3749_s1 = smov 17  }
  0x3f   : > { %v1188_v12 = vld [vmem:[%s3785_s12] sm:$0xff]  ;;  %s2490_s12 = sld [smem:[#allocation5 + $0x8]] }
  0x43   : > { %v1024_v58 = vld [vmem:[%s3780_s2] sm:$0xff]  ;;  %s3782_s2 = sld [smem:[#allocation17_spill]] }
  0xab   : > { %v868_v3 = vpop.permute.xlu0 %867 }
  0xac   : > { %v869_v4 = vsel %vm866_vm0, %v868_v3, %v2992_v2 }
  0xad   : > { %870 = vrot.lane.b32.xlu0 %v869_v4, %s3736_s3 }
 0x11f   : > { %v871_v6 = vpop.permute.xlu0 %870 }
 0x120   : > { %v872_v7 = vsel %vm866_vm0, %v871_v6, %v2992_v2 }
 0x121   : > { %894 = vrot.lane.b32.xlu0 %v872_v7, %s3730_s7  ;;  %878 = vrot.lane.b32.xlu1 %v872_v7, %s3740_s28  ;;  %s3789_s7 = smov 119  }
 0x125   : > { %910 = vrot.lane.b32.xlu0 %v872_v7, %s3738_s8  ;;  %886 = vrot.lane.b32.xlu1 %v872_v7, %s3734_s4  ;;  %s3790_s4 = smov 71  }
 0x129   : > { %926 = vrot.lane.b32.xlu0 %v872_v7, %s3724_s20  ;;  %902 = vrot.lane.b32.xlu1 %v872_v7, %s3728_s0  ;;  %s3778_s20 = sld [smem:[#allocation11_spill]]  ;;  %s3783_s0 = sld [smem:[#allocation18_spill]] }
 0x12d   : > { %918 = vrot.lane.b32.xlu1 %v872_v7, %s3726_s22  ;;  %941 = vperm.xlu0 %2747, %v938_v9   ;;  %s3781_s22 = sld [smem:[#allocation16_spill]] }
 0x12f   : > { %v859_v15 = vld [vmem:[%s3778_s20] sm:$0xff]  ;;  %v3071_v46 = vld [vmem:[%s3778_s20 + $0x8] ss:$0 sm:$0xff] }
 0x130   : > { %v3029_v18 = vrot.slane %v859_v15, %v3019_v13  ;;  %v3032_v19 = vrot.slane %v859_v15, %v3021_v14  ;;  %v3039_v24 = vrot.slane %v859_v15, %v3026_v17  ;;  %v3044_v27 = vrot.slane %v859_v15, %v3034_v20  ;;  %v1107_v4 = vld [vmem:[%s3783_s0] sm:$0xf]  ;;  %s3791_s0 = smov 65  }
 0x131   : > { %934 = vrot.lane.b32.xlu1 %v872_v7, %s3732_s10  ;;  %v3047_v28 = vrot.slane %v859_v15, %v3036_v22  ;;  %v3058_v38 = vrot.slane %v859_v15, %v3049_v30  ;;  %v3061_v40 = vrot.slane %v859_v15, %v3052_v34  ;;  %s3787_s10 = sld [smem:[#allocation10_spill]] }
 0x133   : > { %v1025_v59 = vld [vmem:[%s3781_s22] sm:$0xff]  ;;  %s2459_s22 = sshll.u32 %s3810_s18, 2  ;;  %s3788_s18 = smov 72  }
 0x193   : > { %v879_v16 = vpop.permute.xlu1 %878  ;;  %v895_v21 = vpop.permute.xlu0 %894 }
 0x194   : > { %v881_v25 = vmul.f32 %v879_v16, %v3029_v18  ;;  %v897_v33 = vmul.f32 %v895_v21, %v3039_v24  ;;  %v1181_v21 = vld [vmem:[%s3786_s11] sm:$0xff]  ;;  %s2486_s11 = sld [smem:[#allocation5 + $0x4]] }
 0x197   : > { %v887_v23 = vpop.permute.xlu1 %886  ;;  %v911_v31 = vpop.permute.xlu0 %910 }
 0x198   : > { %v889_v26 = vmul.f32 %v887_v23, %v3032_v19  ;;  %v913_v36 = vmul.f32 %v911_v31, %v3047_v28 }
 0x19a   : > { %v2622_v29 = vpack.c.bf16 %v889_v26, %v881_v25  ;;  %v2628_v42 = vpack.c.bf16 %v913_v36, %v2992_v2  ;;  %v1106_v2 = vld [vmem:[%s3782_s2] sm:$0xf]  ;;  %s841_s2 = scalar_lea.vmem %s3784_s30, %s2459_s22  ;;  %s3130_s22 = scalar_lea.vmem %s3787_s10, %s2983_s5 }
 0x19b   : > { %v903_v32 = vpop.permute.xlu1 %902  ;;  %v927_v41 = vpop.permute.xlu0 %926  ;;  %v3110_v10 = vld [vmem:[%s841_s2] sm:$0xf]  ;;  %s3753_s30 = smov 16   ;;  %s3743_s2 = smov 112  }
 0x19c   : > { %v905_v35 = vmul.f32 %v903_v32, %v3044_v27  ;;  %2623 = vmatpush3.bf16.msra.mxu0 %v2622_v29  ;;  %v929_v44 = vmul.f32 %v927_v41, %v3061_v40  ;;  %v3133_v26 = vld [vmem:[%s3130_s22] sm:$0xff]  ;;  %s3745_s10 = smov 113   ;;  %v1659_v41 = vld [vmem:[#allocation2] sm:$0x1] }
 0x19d   : > { %2624 = vmatprep.subr.bf16.mxu0 %v2794_v5  ;;  %v3152_v36 = vcombine.high %v3133_v26, %v3133_v26 }
 0x19e   : > { %v2625_v37 = vpack.c.bf16 %v905_v35, %v897_v33 }
 0x19f   : > { %v919_v39 = vpop.permute.xlu1 %918 }
 0x1a0   : > { %2626 = vmatpush3.bf16.msra.mxu0 %v2625_v37  ;;  %v921_v43 = vmul.f32 %v919_v39, %v3058_v38 }
 0x1a1   : > { %2627 = vmatprep.subr.bf16.mxu0 %v2794_v5 }
 0x1a2   : > { %v2631_v45 = vpack.c.bf16 %v929_v44, %v921_v43 }
 0x1a3   : > { %v935_v47 = vpop.permute.xlu1 %934 }
 0x1a4   : > { %2629 = vmatpush3.bf16.msra.mxu0 %v2628_v42  ;;  %v937_v48 = vmul.f32 %v3071_v46, %v935_v47 }
 0x1a5   : > { %2630 = vmatprep.subr.bf16.mxu0 %v2794_v5 }
 0x1a8   : > { %2632 = vmatpush3.bf16.msra.mxu0 %v2631_v45 }
 0x1a9   : > { %2575 = vmatprep.subr.mxu0 %v2801_v8 }
 0x1ac   : > { %2576 = vmatpush3.msra.mxu0 %v937_v48  ;;  %v942_v50 = vpop.permute.xlu0 %941 }
 0x1ad   : > { %2578 = vmatmul.mubr.msk.f32.vlgmr.msra.gmra.mrb[0].mxu0 %vm944_vm2, %v865_v49  ;;  %2616 = vmatprep.subr.mxu0 %v2801_v8 }
 0x1ae   : > { %2618 = vmatprep.mubr.msk.f32.mxu0 %vm2802_vm1, %v2801_v8  ;;  %2617 = vmatpush3.msk.msra.mxu0 %vm1198_vm5, %v3110_v10 }
 0x280   : > { %v1014_v51 = vpop.f32.mrb[0].mxu0 }
 0x281   : > { %v1015_v52 = vadd.f32 %v1014_v51, %v942_v50  ;;  %v2579_v53 = vpop.f32.mrb[1].mxu0 }
 0x283   : > { %v1018_v54 = vmax.f32 %v1015_v52, 0.0 }
 0x285   : > { %v1020_v55 = vsel %vm1019_vm3, %v1018_v54, 0.0 }
 0x286   : > { %1021 = vadd.xlane.f32.xlu1 %v1020_v55 }
 0x297   : > { %1542 = vrot.lane.b32.xlu1 %v3133_v26, %s3747_s6 }
 0x29b   : > { %1489 = vrot.lane.b32.xlu1 %v3133_v26, %s3749_s1 }
 0x29f   : > { %1525 = vrot.lane.b32.xlu1 %v3133_v26, %s3751_s9 }
 0x2a3   : > { %1559 = vrot.lane.b32.xlu1 %v3133_v26, %s3738_s8 }
 0x313   : > { %v1022_v56 = vpop.xlane.xlu1 %1021 }
 0x314   : > { %v1023_v57 = vmul.f32 0.015625, %v1022_v56 }
 0x316   : > { %2581 = vmatpush3.msra.mxu1 %v1023_v57  ;;  %v3191_v57 = vand.u32 127, %v873_v11 }
 0x317   : > { %2583 = vmatmul.mubr.msk.f32.vlgmr.msra.gmra.mrb[0].mxu1 %vm1026_vm4, %v1024_v58  ;;  %2585 = vmatprep.subr.mxu1 %v2801_v8  ;;  %v1543_v47 = vpop.permute.xlu1 %1542 }
 0x318   : > { %2587 = vmatprep.mubr.msk.f32.mxu1 %vm2802_vm1, %v2801_v8  ;;  %vm1512_vm7 = vcmp.lt.s32.totalorder %v3191_v57, 16  ;;  %vm1546_vm8 = vcmp.lt.s32.totalorder %v3191_v57, 1  ;;  %vm1495_vm9 = vcmp.lt.s32.totalorder %v3191_v57, 17  ;;  %vm1529_vm10 = vcmp.lt.s32.totalorder %v3191_v57, 15 }
 0x319   : > { %vm1563_vm11 = vcmp.lt.s32.totalorder %v3191_v57, 127  ;;  %vm1597_vm12 = vcmp.lt.s32.totalorder %v3191_v57, 112  ;;  %vm1580_vm13 = vcmp.lt.s32.totalorder %v3191_v57, 113  ;;  %vm1614_vm14 = vcmp.lt.s32.totalorder %v3191_v57, 111 }
 0x31b   : > { %v1490_v49 = vpop.permute.xlu1 %1489 }
 0x31f   : > { %v1526_v51 = vpop.permute.xlu1 %1525 }
 0x323   : > { %v1560_v53 = vpop.permute.xlu1 %1559 }
 0x3ea   : > { %v1096_v60 = vpop.f32.mrb[0].mxu1 }
 0x3eb   : > { %v1097_v61 = vadd.f32 %v1096_v60, %v1025_v59  ;;  %v2584_v62 = vpop.f32.mrb[1].mxu1 }
 0x3ed   : > { %v2468_v63 = vmul.f32 -1.442695, %v1097_v61 }
 0x3ef   : > { %2750 = vpow2.f32 %v2468_v63 }
 0x3f9   : > { %v2751_v0 = vpop.eup %2750 }
 0x3fa   : > { %v1103_v1 = vadd.f32 1.0, %v2751_v0 }
 0x3fc   : > { %2752 = vrcp.f32 %v1103_v1 }
 0x406   : > { %v3096_v3 = vpop.eup %2752 }
 0x407   : > { %2586 = vmatpush3.msra.mxu1 %v3096_v3 }
 0x408   : > { %2588 = vmatmul.mubr.msk.f32.vlgmr.msra.gmra.mrb[2].mxu1 %vm1026_vm4, %v1106_v2  ;;  %2590 = vmatprep.subr.mxu1 %v2801_v8  ;;  %vm1865_vm4 = vcmask 1042432  }
 0x409   : > { %2592 = vmatprep.mubr.msk.f32.mxu1 %vm2802_vm1, %v2801_v8 }
 0x4db   : > { %v1177_v6 = vpop.f32.mrb[2].mxu1 }
 0x4dc   : > { %v1178_v7 = vadd.f32 %v1177_v6, %v1107_v4  ;;  %v2589_v9 = vpop.f32.mrb[3].mxu1 }
 0x4de   : > { %1184 = vperm.xlu0 %2747, %v1178_v7  }
 0x4e2   : > { %1191 = vperm.xlu0 %2747, %v1188_v12  }
 0x55d   : > { %v1185_v15 = vpop.permute.xlu0 %1184 }
 0x55e   : > { %v1187_v16 = vmul.f32 %v1185_v15, %v3110_v10 }
 0x560   : > { %2591 = vmatpush3.msk.msra.mxu1 %vm1198_vm5, %v1187_v16 }
 0x561   : > { %2593 = vmatmul.mubr.msk.f32.vlgmr.msra.gmra.mrb[4].mxu1 %vm1194_vm6, %v1181_v21  ;;  %2633 = vmatprep.subr.bf16.mxu1 %v2794_v5  ;;  %v1192_v23 = vpop.permute.xlu0 %1191 }
 0x562   : > { %2613 = vmatprep.mubr.msk.f32.mxu1 %vm2802_vm1, %v2801_v8  ;;  %vm1859_vm1 = vcmask 1040384  }
 0x634   : > { %v1268_v25 = vpop.f32.mrb[4].mxu1 }
 0x635   : > { %v1269_v29 = vadd.f32 %v1268_v25, %v1192_v23  ;;  %v2594_v31 = vpop.f32.mrb[5].mxu1 }
 0x637   : > { %v3137_v32 = vmax.f32 %v1269_v29, 0.0 }
 0x639   : > { %1274 = vrot.lane.b32.xlu0 %v3137_v32, %s3736_s3 }
 0x6ab   : > { %v1275_v33 = vpop.permute.xlu0 %1274 }
 0x6ac   : > { %v1276_v35 = vsel %vm866_vm0, %v1275_v33, %v3137_v32 }
 0x6ad   : > { %1277 = vrot.lane.b32.xlu0 %v1276_v35, %s3736_s3  ;;  %s3792_s3 = smov 121  }
 0x6b1   : > { %1508 = vrot.lane.b32.xlu0 %v3133_v26, %s3753_s30 }
 0x6b5   : > { %1510 = vrot.lane.b32.xlu0 %v3152_v36, %s3753_s30  ;;  %s3802_s30 = smov 113  }
 0x6b9   : > { %1544 = vrot.lane.b32.xlu0 %v3152_v36, %s3747_s6  ;;  %s3798_s6 = smov 15  }
 0x6bd   : > { %1491 = vrot.lane.b32.xlu0 %v3152_v36, %s3749_s1  ;;  %s3799_s1 = smov 17  }
 0x6c1   : > { %1527 = vrot.lane.b32.xlu0 %v3152_v36, %s3751_s9  ;;  %s3801_s9 = smov 127  }
 0x6c5   : > { %1561 = vrot.lane.b32.xlu0 %v3152_v36, %s3738_s8 }
 0x71f   : > { %v1278_v37 = vpop.permute.xlu0 %1277 }
 0x720   : > { %v1279_v39 = vsel %vm866_vm0, %v1278_v37, %v3137_v32 }
 0x721   : > { %1297 = vrot.lane.b32.xlu1 %v1279_v39, %s3738_s8  ;;  %1281 = vrot.lane.b32.xlu0 %v1279_v39, %s3740_s28  ;;  %s3741_s8 = smov 111   ;;  %s3793_s28 = smov 120  }
 0x723   : > { %v1509_v42 = vpop.permute.xlu0 %1508 }
 0x725   : > { %1593 = vrot.lane.b32.xlu1 %v3133_v26, %s3743_s2  ;;  %1285 = vrot.lane.b32.xlu0 %v1279_v39, %s3788_s18 }
 0x727   : > { %v1511_v43 = vpop.permute.xlu0 %1510 }
 0x728   : > { %v1513_v2 = vsel %vm1512_vm7, %v1509_v42, %v1511_v43  ;;  %v1514_v16 = vsel %vm1512_vm7, %v1511_v43, %v1509_v42 }
 0x729   : > { %1309 = vrot.lane.b32.xlu1 %v1279_v39, %s3789_s7  ;;  %1289 = vrot.lane.b32.xlu0 %v1279_v39, %s3790_s4 }
 0x72b   : > { %v1545_v44 = vpop.permute.xlu0 %1544 }
 0x72c   : > { %v1547_v4 = vsel %vm1546_vm8, %v1543_v47, %v1545_v44  ;;  %v1548_v21 = vsel %vm1546_vm8, %v1545_v44, %v1543_v47 }
 0x72d   : > { %1293 = vrot.lane.b32.xlu0 %v1279_v39, %s3791_s0  ;;  %1578 = vrot.lane.b32.xlu1 %v3152_v36, %s3745_s10 }
 0x72f   : > { %v1492_v45 = vpop.permute.xlu0 %1491 }
 0x730   : > { %v1496_v37 = vsel %vm1495_vm9, %v1490_v49, %v1492_v45  ;;  %v1497_v47 = vsel %vm1495_vm9, %v1492_v45, %v1490_v49 }
 0x731   : > { %1301 = vrot.lane.b32.xlu0 %v1279_v39, %s3792_s3  ;;  %1612 = vrot.lane.b32.xlu1 %v3152_v36, %s3741_s8 }
 0x733   : > { %v1528_v48 = vpop.permute.xlu0 %1527 }
 0x735   : > { %1305 = vrot.lane.b32.xlu0 %v1279_v39, %s3793_s28  ;;  %v1530_v39 = vsel %vm1529_vm10, %v1526_v51, %v1528_v48 }
 0x737   : > { %v1562_v50 = vpop.permute.xlu0 %1561 }
 0x738   : > { %v1565_v45 = vsel %vm1563_vm11, %v1562_v50, %v1560_v53 }
 0x739   : > { %1595 = vrot.lane.b32.xlu0 %v3152_v36, %s3743_s2  ;;  %s3800_s2 = smov 1  }
 0x73d   : > { %1576 = vrot.lane.b32.xlu0 %v3133_v26, %s3745_s10  ;;  %s3794_s10 = sld [smem:[#allocation12_spill]] }
 0x741   : > { %1610 = vrot.lane.b32.xlu0 %v3133_v26, %s3741_s8  ;;  %s3797_s8 = smov 16  }
 0x743   : > { %v3196_v60 = vld [vmem:[%s3794_s10] sm:$0xff]  ;;  %v3201_v61 = vld [vmem:[%s3794_s10 + $0x8] sm:$0xff] }
 0x744   : > { %v3209_v11 = vrot.slane %v3196_v60, %v3021_v14  ;;  %v3213_v63 = vrot.slane %v3201_v61, %v3021_v14  ;;  %v3217_v0 = vrot.slane %v3201_v61, %v3034_v20  ;;  %v3228_v14 = vrot.slane %v3196_v60, %v3034_v20 }
 0x745   : > { %1662 = vperm.xlu0 %2747, %v1659_v41   ;;  %v1501_v9 = vrot.slane %v3196_v60, %v3019_v13  ;;  %v1505_v12 = vrot.slane %v3201_v61, %v3019_v13  ;;  %v1535_v15 = vrot.slane %v3196_v60, %v3026_v17  ;;  %v1539_v31 = vrot.slane %v3201_v61, %v3026_v17 }
 0x746   : > { %v1524_v20 = vmul.f32 %v3213_v63, %v1513_v2  ;;  %v1558_v29 = vmul.f32 %v3217_v0, %v1547_v4  ;;  %v3252_v41 = vrot.slane %v3196_v60, %v3036_v22  ;;  %v3256_v42 = vrot.slane %v3201_v61, %v3036_v22 }
 0x747   : > { %v1523_v17 = vmul.f32 %v3209_v11, %v1514_v16  ;;  %v1557_v43 = vmul.f32 %v3228_v14, %v1548_v21  ;;  %v3264_v44 = vrot.slane %v3196_v60, %v3052_v34  ;;  %v1531_v22 = vsel %vm1529_vm10, %v1528_v48, %v1526_v51 }
 0x748   : > { %v1540_v2 = vmul.f32 %v1535_v15, %v1531_v22  ;;  %v1590_v16 = vrot.slane %v3201_v61, %v3049_v30 }
 0x749   : > { %v1635_v51 = vrot.slane %v1557_v43, 4 }
 0x793   : > { %v1282_v52 = vpop.permute.xlu0 %1281  ;;  %v1298_v62 = vpop.permute.xlu1 %1297 }
 0x794   : > { %v1284_v55 = vmul.f32 %v1282_v52, %v3029_v18  ;;  %v1300_v23 = vmul.f32 %v1298_v62, %v3047_v28 }
 0x796   : > { %v2640_v52 = vpack.c.bf16 %v1300_v23, %v3137_v32  ;;  %v1629_v32 = vrot.slane %v1523_v17, 4 }
 0x797   : > { %v1286_v54 = vpop.permute.xlu0 %1285  ;;  %v1594_v33 = vpop.permute.xlu1 %1593 }
 0x798   : > { %v1288_v56 = vmul.f32 %v1286_v54, %v3032_v19  ;;  %v3273_v54 = vrot.slane %v3201_v61, %v3052_v34  ;;  %v1506_v34 = vmul.f32 %v1501_v9, %v1497_v47  ;;  %v3312_v47 = vld [vmem:[%s3794_s10 + $0x10] sm:$0x1] }
 0x79a   : > { %v2634_v58 = vpack.c.bf16 %v1288_v56, %v1284_v55  ;;  %v1630_v55 = vrot.slane %v1524_v20, 4  ;;  %v1636_v56 = vrot.slane %v1558_v29, 4  ;;  %v1651_v23 = vsel %vm1198_vm5, %v1506_v34, %v1629_v32 }
 0x79b   : > { %v1290_v59 = vpop.permute.xlu0 %1289  ;;  %v1310_v4 = vpop.permute.xlu1 %1309 }
 0x79c   : > { %2635 = vmatpush3.bf16.msra.mxu1 %v2634_v58  ;;  %v1292_v6 = vmul.f32 %v1290_v59, %v3039_v24  ;;  %v1507_v58 = vmul.f32 %v1505_v12, %v1496_v37  ;;  %v1541_v59 = vmul.f32 %v1539_v31, %v1530_v39  ;;  %v1575_v12 = vmul.f32 %v3256_v42, %v1565_v45  ;;  %v3303_v31 = vld [vmem:[%s3794_s10 + $0x18] sm:$0x1] }
 0x79d   : > { %2636 = vmatprep.subr.bf16.mxu1 %v2794_v5  ;;  %v1620_v45 = vrot.slane %v3312_v47, %v3019_v13 }
 0x79e   : > { %v1652_v15 = vsel %vm1198_vm5, %v1507_v58, %v1630_v55  ;;  %v1654_v21 = vsel %vm1198_vm5, %v1541_v59, %v1636_v56  ;;  %v1642_v39 = vrot.slane %v1575_v12, 4  ;;  %v1624_v55 = vrot.slane %v3303_v31, %v3019_v13 }
 0x79f   : > { %v1294_v1 = vpop.permute.xlu0 %1293  ;;  %v2645_v43 = vpack.c.bf16 %v1654_v21, %v1652_v15 }
 0x7a0   : > { %v1296_v7 = vmul.f32 %v1294_v1, %v3044_v27  ;;  %v1564_v1 = vsel %vm1563_vm11, %v1560_v53, %v1562_v50  ;;  %v1586_v53 = vrot.slane %v3196_v60, %v3049_v30  ;;  %v1579_v30 = vpop.permute.xlu1 %1578 }
 0x7a2   : > { %v2637_v25 = vpack.c.bf16 %v1296_v7, %v1292_v6  ;;  %v1574_v7 = vmul.f32 %v3252_v41, %v1564_v1 }
 0x7a3   : > { %v1302_v35 = vpop.permute.xlu0 %1301 }
 0x7a4   : > { %2638 = vmatpush3.bf16.msra.mxu1 %v2637_v25  ;;  %v1304_v49 = vmul.f32 %v1302_v35, %v3058_v38  ;;  %v1653_v25 = vsel %vm1198_vm5, %v1540_v2, %v1635_v51  ;;  %v1273_v35 = vld [vmem:[%s3795_s13] sm:$0xff]  ;;  %v1641_v37 = vrot.slane %v1574_v7, 4  ;;  %v1613_v1 = vpop.permute.xlu1 %1612  ;;  %v1656_v51 = vsel %vm1198_vm5, %v3152_v36, %v1642_v39  ;;  %s3804_s13 = smov 111  }
 0x7a5   : > { %2639 = vmatprep.subr.bf16.mxu1 %v2794_v5  ;;  %v1393_v39 = vld [vmem:[%s3805_s15] sm:$0xff]  ;;  %s2484_s15 = sld [smem:[#allocation5 + $0x2]] }
 0x7a6   : > { %2619 = vmatmul.mubr.msk.f32.vlgmr.msra.gmra.mrb[2].mxu0 %vm1194_vm6, %v1393_v39  ;;  %vm1870_vm6 = vcmask 1044480  }
 0x7a7   : > { %v1306_v62 = vpop.permute.xlu0 %1305 }
 0x7a8   : > { %v1308_v48 = vmul.f32 %v1306_v62, %v3061_v40  ;;  %2641 = vmatpush3.bf16.msra.mxu1 %v2640_v52  ;;  %v2647_v52 = vpack.c.bf16 %v1653_v25, %v1651_v23 }
 0x7a9   : > { %2642 = vmatprep.subr.bf16.mxu1 %v2794_v5 }
 0x7aa   : > { %v2643_v6 = vpack.c.bf16 %v1308_v48, %v1304_v49  ;;  %v1655_v49 = vsel %vm1198_vm5, %v3133_v26, %v1641_v37  ;;  %v1485_v26 = vld [vmem:[%s3796_s17] sm:$0x1]  ;;  %v1879_v37 = vld [vmem:[#allocation3] sm:$0x1]  ;;  %s3808_s17 = smov 73  }
 0x7ab   : > { %v1596_v50 = vpop.permute.xlu0 %1595 }
 0x7ac   : > { %v1598_v9 = vsel %vm1597_vm12, %v1594_v33, %v1596_v50  ;;  %v1599_v5 = vsel %vm1597_vm12, %v1596_v50, %v1594_v33  ;;  %2644 = vmatpush3.bf16.msra.mxu1 %v2643_v6  ;;  %v1312_v33 = vmul.f32 %v3071_v46, %v1310_v4 }
 0x7ad   : > { %v1608_v20 = vmul.f32 %v3264_v44, %v1598_v9  ;;  %v1609_v29 = vmul.f32 %v3273_v54, %v1599_v5  ;;  %2611 = vmatprep.subr.mxu1 %v2801_v8 }
 0x7af   : > { %v1577_v17 = vpop.permute.xlu0 %1576  ;;  %v1647_v56 = vrot.slane %v1608_v20, 4  ;;  %v1648_v58 = vrot.slane %v1609_v29, 4 }
 0x7b0   : > { %v1581_v22 = vsel %vm1580_vm13, %v1577_v17, %v1579_v30  ;;  %v1582_v46 = vsel %vm1580_vm13, %v1579_v30, %v1577_v17  ;;  %2612 = vmatpush3.msra.mxu1 %v1312_v33  ;;  %v1998_v30 = vld [vmem:[%s3717_s23 + $0x80] sm:$0xff]  ;;  %v1999_v33 = vld [vmem:[%s3717_s23 + $0x88] sm:$0xff] }
 0x7b1   : > { %v1591_v59 = vmul.f32 %v1586_v53, %v1581_v22  ;;  %v1592_v62 = vmul.f32 %v1590_v16, %v1582_v46  ;;  %2646 = vmatprep.subr.bf16.mxu1 %v2645_v43  ;;  %2614 = vmatmul.mubr.msk.f32.vlgmr.msra.gmra.mrb[6].mxu1 %vm944_vm2, %v1273_v35  ;;  %v2659_v35 = vpack.c.bf16 %v1999_v33, %v1998_v30  ;;  %vm1862_vm2 = vcmask 1041408  }
 0x7b2   : > { %2648 = vmatpush1.bf16.msra.mxu1 %v2647_v52  ;;  %1743 = vmatprep.mubr.f32.mxu1 %v2801_v8 }
 0x7b3   : > { %v1657_v48 = vsel %vm1198_vm5, %v1591_v59, %v1647_v56  ;;  %v1611_v32 = vpop.permute.xlu0 %1610  ;;  %v1658_v34 = vsel %vm1198_vm5, %v1592_v62, %v1648_v58  ;;  %2660 = vmatprep.subr.bf16.mxu0 %v2659_v35 }
 0x7b4   : > { %v2649_v2 = vpack.c.bf16 %v1658_v34, %v1656_v51  ;;  %v1615_v4 = vsel %vm1614_vm14, %v1611_v32, %v1613_v1  ;;  %v1616_v6 = vsel %vm1614_vm14, %v1613_v1, %v1611_v32  ;;  %v2651_v7 = vpack.c.bf16 %v1657_v48, %v1655_v49 }
 0x7b5   : > { %v1626_v12 = vmul.f32 %v1624_v55, %v1616_v6  ;;  %v1625_v50 = vmul.f32 %v1620_v45, %v1615_v4 }
 0x7b6   : > { %2650 = vmatprep.subr.bf16.mxu1 %v2649_v2 }
 0x7b7   : > { %2652 = vmatpush1.bf16.msra.mxu1 %v2651_v7 }
 0x7b8   : > { %2475 = vmatprep.subr.msk.mxu1 %vm1198_vm5, %v1626_v12 }
 0x7bb   : > { %2476 = vmatpush1.msk.msra.mxu1 %vm1198_vm5, %v1625_v50 }
 0x7bc   : > { %2477 = vmatmul.mubr.msk.f32.vlgmr.msra.gmra.mrb[8].mxu1 %vm1669_vm15, %v1485_v26 }
 0x7bd   : > { %1963 = vmatprep.mubr.f32.mxu1 %v2801_v8 }
 0x7c4   : > { %v1663_v9 = vpop.permute.xlu0 %1662 }
 0x7c5   : > { %v1668_v5 = vrot.slane %v1663_v9, %v3019_v13 }
 0x884   : > { %v3341_v53 = vpop.f32.mrb[6].mxu1 }
 0x885   : > { %v2615_v16 = vpop.f32.mrb[7].mxu1 }
 0x88f   : > { %v1745_v15 = vpop.f32.mrb[8].mxu1 }
 0x890   : > { %v1746_v21 = vadd.f32 %v1745_v15, %v1668_v5  ;;  %v1747_v23 = vpop.f32.mrb[9].mxu1 }
 0x891   : > { %v1748_v25 = vadd.f32 %v1747_v23, %v1668_v5 }
 0x892   : > { %v3344_v20 = vmax.f32 %v1746_v21, 0.0 }
 0x893   : > { %v3346_v29 = vmax.f32 %v1748_v25, 0.0 }
 0x894   : > { %1761 = vrot.lane.b32.xlu1 %v3344_v20, %s3797_s8 }
 0x895   : > { %1763 = vrot.lane.b32.xlu0 %v3346_v29, %s3797_s8 }
 0x898   : > { %1775 = vrot.lane.b32.xlu1 %v3344_v20, %s3798_s6 }
 0x899   : > { %1777 = vrot.lane.b32.xlu0 %v3346_v29, %s3798_s6  ;;  %s3803_s6 = smov 112  }
 0x89c   : > { %1753 = vrot.lane.b32.xlu1 %v3344_v20, %s3799_s1 }
 0x89d   : > { %1755 = vrot.lane.b32.xlu0 %v3346_v29, %s3799_s1  ;;  %s2089_s1 = sld [smem:[#allocation4]] }
 0x8a0   : > { %1789 = vrot.lane.b32.xlu1 %v3344_v20, %s3800_s2 }
 0x8a1   : > { %1791 = vrot.lane.b32.xlu0 %v3346_v29, %s3800_s2 }
 0x8a4   : > { %1803 = vrot.lane.b32.xlu1 %v3344_v20, %s3801_s9 }
 0x8a5   : > { %1805 = vrot.lane.b32.xlu0 %v3346_v29, %s3801_s9 }
 0x8a8   : > { %1817 = vrot.lane.b32.xlu1 %v3344_v20, %s3802_s30 }
 0x8a9   : > { %1819 = vrot.lane.b32.xlu0 %v3346_v29, %s3802_s30  ;;  %s2485_s30 = sld [smem:[#allocation5 + $0x3]] }
 0x8ac   : > { %1831 = vrot.lane.b32.xlu1 %v3344_v20, %s3803_s6 }
 0x8ad   : > { %1833 = vrot.lane.b32.xlu0 %v3346_v29, %s3803_s6 }
 0x8b0   : > { %1845 = vrot.lane.b32.xlu1 %v3344_v20, %s3804_s13 }
 0x8b1   : > { %1847 = vrot.lane.b32.xlu0 %v3346_v29, %s3804_s13  ;;  %s3807_s13 = smov 64  }
 0x8b4   : > { %1882 = vperm.xlu1 %2748, %v1879_v37  }
 0x906   : > { %v1762_v17 = vpop.permute.xlu1 %1761 }
 0x907   : > { %v1764_v43 = vpop.permute.xlu0 %1763 }
 0x908   : > { %v1765_v56 = vsel %vm1512_vm7, %v1762_v17, %v1764_v43  ;;  %v1766_v58 = vsel %vm1512_vm7, %v1764_v43, %v1762_v17 }
 0x909   : > { %v1769_v62 = vrot.slane %v1766_v58, 7  ;;  %v1770_v1 = vrot.slane %v1765_v56, 7 }
 0x90a   : > { %v1776_v22 = vpop.permute.xlu1 %1775 }
 0x90b   : > { %v1778_v46 = vpop.permute.xlu0 %1777  ;;  %v1773_v12 = vmul.f32 %v1769_v62, %v3196_v60  ;;  %v1774_v50 = vmul.f32 %v1770_v1, %v3201_v61  ;;  %v1856_v1 = vrot.slane %v3346_v29, 4 }
 0x90c   : > { %v1779_v34 = vsel %vm1529_vm10, %v1776_v22, %v1778_v46  ;;  %v1780_v2 = vsel %vm1529_vm10, %v1778_v46, %v1776_v22  ;;  %vm1876_vm10 = vcmask 1046528  }
 0x90d   : > { %v1783_v5 = vrot.slane %v1780_v2, 6  ;;  %v1784_v15 = vrot.slane %v1779_v34, 6 }
 0x90e   : > { %v1754_v52 = vpop.permute.xlu1 %1753 }
 0x90f   : > { %v1756_v55 = vpop.permute.xlu0 %1755  ;;  %v1787_v22 = vmul.f32 %v1783_v5, %v3196_v60  ;;  %v1788_v46 = vmul.f32 %v1784_v15, %v3201_v61 }
 0x910   : > { %v1757_v45 = vsel %vm1495_vm9, %v1754_v52, %v1756_v55  ;;  %v1758_v49 = vsel %vm1495_vm9, %v1756_v55, %v1754_v52  ;;  %vm1873_vm9 = vcmask 1045504  }
 0x911   : > { %v1759_v4 = vmul.f32 %v1758_v49, %v3196_v60  ;;  %v1760_v6 = vmul.f32 %v1757_v45, %v3201_v61 }
 0x912   : > { %v1790_v59 = vpop.permute.xlu1 %1789 }
 0x913   : > { %v1792_v48 = vpop.permute.xlu0 %1791  ;;  %v1860_v30 = vsel %vm1859_vm1, %v1759_v4, %v1773_v12  ;;  %v1861_v33 = vsel %vm1859_vm1, %v1760_v6, %v1774_v50 }
 0x914   : > { %v1793_v32 = vsel %vm1546_vm8, %v1790_v59, %v1792_v48  ;;  %v1794_v51 = vsel %vm1546_vm8, %v1792_v48, %v1790_v59  ;;  %v1855_v59 = vrot.slane %v3344_v20, 4  ;;  %v1863_v45 = vsel %vm1862_vm2, %v1860_v30, %v1787_v22  ;;  %v1752_v22 = vld [vmem:[%s3806_s19] sm:$0x1] }
 0x915   : > { %v1797_v26 = vrot.slane %v1794_v51, 5  ;;  %v1798_v16 = vrot.slane %v1793_v32, 5  ;;  %v1864_v49 = vsel %vm1862_vm2, %v1861_v33, %v1788_v46 }
 0x916   : > { %v1804_v7 = vpop.permute.xlu1 %1803 }
 0x917   : > { %v1806_v9 = vpop.permute.xlu0 %1805  ;;  %v1801_v35 = vmul.f32 %v1797_v26, %v3196_v60  ;;  %v1802_v37 = vmul.f32 %v1798_v16, %v3201_v61 }
 0x918   : > { %v1807_v21 = vsel %vm1563_vm11, %v1804_v7, %v1806_v9  ;;  %v1808_v23 = vsel %vm1563_vm11, %v1806_v9, %v1804_v7 }
 0x919   : > { %v1811_v39 = vrot.slane %v1807_v21, 3  ;;  %v1812_v17 = vrot.slane %v1808_v23, 3  ;;  %v1866_v34 = vsel %vm1865_vm4, %v1863_v45, %v1801_v35  ;;  %v1867_v2 = vsel %vm1865_vm4, %v1864_v49, %v1802_v37  ;;  %v1986_v49 = vld [vmem:[%s3717_s23 + $0x20] sm:$0xff] }
 0x91a   : > { %v1818_v25 = vpop.permute.xlu1 %1817  ;;  %v1868_v26 = vsel %vm1198_vm5, %v1866_v34, %v1855_v59  ;;  %v1869_v16 = vsel %vm1198_vm5, %v1867_v2, %v1856_v1  ;;  %v2003_v1 = vld [vmem:[%s3717_s23 + $0xa8] sm:$0xff]  ;;  %v2005_v34 = vld [vmem:[%s3717_s23 + $0xb8] sm:$0xff] }
 0x91b   : > { %v1820_v43 = vpop.permute.xlu0 %1819  ;;  %v1815_v48 = vmul.f32 %v1811_v39, %v3196_v60  ;;  %v1816_v32 = vmul.f32 %v1812_v17, %v3201_v61 }
 0x91c   : > { %v1821_v52 = vsel %vm1580_vm13, %v1818_v25, %v1820_v43  ;;  %v1822_v55 = vsel %vm1580_vm13, %v1820_v43, %v1818_v25  ;;  %vm2813_vm13 = vmmov 1  }
 0x91d   : > { %v1825_v56 = vrot.slane %v1821_v52, 2  ;;  %v1826_v58 = vrot.slane %v1822_v55, 2  ;;  %v1871_v21 = vsel %vm1870_vm6, %v1868_v26, %v1815_v48  ;;  %v1872_v23 = vsel %vm1870_vm6, %v1869_v16, %v1816_v32  ;;  %vm2654_vm15 = vmpackc.low %vm1859_vm1, %vm2813_vm13  ;;  %v2000_v52 = vld [vmem:[%s3717_s23 + $0x90] sm:$0xff]  ;;  %v2001_v55 = vld [vmem:[%s3717_s23 + $0x98] sm:$0xff] }
 0x91e   : > { %v1832_v62 = vpop.permute.xlu1 %1831  ;;  %v1987_v48 = vld [vmem:[%s3717_s23 + $0x28] sm:$0xff] }
 0x91f   : > { %v1834_v51 = vpop.permute.xlu0 %1833  ;;  %v1829_v4 = vmul.f32 %v1825_v56, %v3196_v60  ;;  %v1830_v20 = vmul.f32 %v1826_v58, %v3201_v61  ;;  %v2663_v56 = vpack.c.bf16 %v2001_v55, %v2000_v52  ;;  %v1985_v58 = vld [vmem:[%s3717_s23 + $0x18] sm:$0xff]  ;;  %v2669_v32 = vpack.c.bf16 %v1987_v48, %v1986_v49  ;;  %v1991_v26 = vld [vmem:[%s3717_s23 + $0x48] sm:$0xff] }
 0x920   : > { %v1835_v29 = vsel %vm1597_vm12, %v1832_v62, %v1834_v51  ;;  %v1836_v6 = vsel %vm1597_vm12, %v1834_v51, %v1832_v62  ;;  %v2002_v62 = vld [vmem:[%s3717_s23 + $0xa0] sm:$0xff]  ;;  %v2004_v51 = vld [vmem:[%s3717_s23 + $0xb0] sm:$0xff] }
 0x921   : > { %v1839_v7 = vrot.slane %v1835_v29, 1  ;;  %v1840_v12 = vrot.slane %v1836_v6, 1  ;;  %v1874_v33 = vsel %vm1873_vm9, %v1871_v21, %v1829_v4  ;;  %v1875_v35 = vsel %vm1873_vm9, %v1872_v23, %v1830_v20  ;;  %v1988_v4 = vld [vmem:[%s3717_s23 + $0x30] sm:$0xff]  ;;  %v1989_v20 = vld [vmem:[%s3717_s23 + $0x38] sm:$0xff]  ;;  %v2006_v6 = vld [vmem:[%s3717_s23 + $0xc0] sm:$0xff] }
 0x922   : > { %v1846_v50 = vpop.permute.xlu1 %1845  ;;  %v2667_v45 = vpack.c.bf16 %v2003_v1, %v2002_v62  ;;  %v2671_v2 = vpack.c.bf16 %v2005_v34, %v2004_v51  ;;  %v2673_v29 = vpack.c.bf16 %v1989_v20, %v1988_v4  ;;  %v1992_v21 = vld [vmem:[%s3717_s23 + $0x50] sm:$0xff]  ;;  %v1993_v23 = vld [vmem:[%s3717_s23 + $0x58] sm:$0xff] }
 0x923   : > { %v1843_v9 = vmul.f32 %v1839_v7, %v3196_v60  ;;  %v1844_v5 = vmul.f32 %v1840_v12, %v3201_v61  ;;  %v1848_v15 = vpop.permute.xlu0 %1847  ;;  %v2007_v7 = vld [vmem:[%s3717_s23 + $0xc8] sm:$0xff] }
 0x924   : > { %v1849_v25 = vsel %vm1614_vm14, %v1846_v50, %v1848_v15  ;;  %v1850_v30 = vsel %vm1614_vm14, %v1848_v15, %v1846_v50  ;;  %vm1889_vm14 = vcmask 72704   ;;  %v2675_v12 = vpack.c.bf16 %v2007_v7, %v2006_v6  ;;  %v1990_v50 = vld [vmem:[%s3717_s23 + $0x40] sm:$0xff] }
 0x925   : > { %v1851_v37 = vmul.f32 %v1849_v25, %v3312_v47  ;;  %v1852_v39 = vmul.f32 %v1850_v30, %v3303_v31  ;;  %v1877_v60 = vsel %vm1876_vm10, %v1874_v33, %v1843_v9  ;;  %v1878_v17 = vsel %vm1876_vm10, %v1875_v35, %v1844_v5  ;;  %v1982_v31 = vld [vmem:[%s3717_s23] sm:$0xff]  ;;  %v1983_v47 = vld [vmem:[%s3717_s23 + $0x8] sm:$0xff]  ;;  %v2008_v9 = vld [vmem:[%s3717_s23 + $0xd0] sm:$0xff] }
 0x926   : > { %v2661_v46 = vpack.c.bf16 %v1983_v47, %v1982_v31  ;;  %v2677_v16 = vpack.c.bf16 %v1991_v26, %v1990_v50  ;;  %v2009_v5 = vld [vmem:[%s3717_s23 + $0xd8] sm:$0xff]  ;;  %v2681_v25 = vpack.c.bf16 %v1993_v23, %v1992_v21  ;;  %v2010_v30 = vld [vmem:[%s3717_s23 + $0xe0] sm:$0xff]  ;;  %v2011_v33 = vld [vmem:[%s3717_s23 + $0xe8] sm:$0xff] }
 0x927   : > { %v2653_v61 = vpack.c.bf16 %v1852_v39, %v1878_v17  ;;  %v2656_v43 = vpack.c.bf16 %v1851_v37, %v1877_v60  ;;  %v2679_v15 = vpack.c.bf16 %v2009_v5, %v2008_v9  ;;  %v1994_v35 = vld [vmem:[%s3717_s23 + $0x60] sm:$0xff]  ;;  %v2683_v37 = vpack.c.bf16 %v2011_v33, %v2010_v30  ;;  %v1995_v39 = vld [vmem:[%s3717_s23 + $0x68] sm:$0xff]  ;;  %v2012_v60 = vld [vmem:[%s3717_s23 + $0xf0] sm:$0xff] }
 0x928   : > { %2662 = vmatpush3.bf16.msra.mxu0 %v2661_v46  ;;  %v2013_v17 = vld [vmem:[%s3717_s23 + $0xf8] sm:$0xff]  ;;  %v3545_v46 = vpop.f32.mrb[2].mxu0  ;;  %v2171_v26 = vld [vmem:[%s3718_s24 + $0x8] sm:$0xff]  ;;  %v2170_v5 = vld [vmem:[%s3718_s24] sm:$0xff] }
 0x929   : > { %2655 = vmatprep.subr.msk.bf16.mxu1 %vm2654_vm15, %v2653_v61  ;;  %2664 = vmatprep.subr.bf16.mxu0 %v2663_v56  ;;  %v2685_v61 = vpack.c.bf16 %v1995_v39, %v1994_v35  ;;  %v1997_v31 = vld [vmem:[%s3717_s23 + $0x78] sm:$0xff]  ;;  %v2620_v52 = vpop.f32.mrb[3].mxu0  ;;  %v2175_v23 = vld [vmem:[%s3718_s24 + $0x28] sm:$0xff]  ;;  %v2174_v33 = vld [vmem:[%s3718_s24 + $0x20] sm:$0xff] }
 0x92a   : > { %2658 = vmatpush1.bf16.msk.msra.mxu1 %vm2654_vm15, %v2656_v43  ;;  %v2687_v43 = vpack.c.bf16 %v2013_v17, %v2012_v60  ;;  %v2176_v35 = vld [vmem:[%s3718_s24 + $0x30] sm:$0xff]  ;;  %v2179_v17 = vld [vmem:[%s3718_s24 + $0x48] sm:$0xff] }
 0x92b   : > { %v2183_v52 = vld [vmem:[%s3718_s24 + $0x68] sm:$0xff] }
 0x92d   : > { %2480 = vmatmul.mubr.msk.f32.vlgmr.msra.gmra.mrb[10].mxu1 %vm1889_vm14, %v1752_v22  ;;  %v1996_v22 = vld [vmem:[%s3717_s23 + $0x70] sm:$0xff] }
 0x92e   : > { %2253 = vmatprep.mubr.f32.mxu1 %v2801_v8  ;;  %v1984_v8 = vld [vmem:[%s3717_s23 + $0x10] sm:$0xff]  ;;  %v2689_v47 = vpack.c.bf16 %v1997_v31, %v1996_v22  ;;  %v2178_v22 = vld [vmem:[%s3718_s24 + $0x40] sm:$0xff] }
 0x92f   : > { %v2665_v59 = vpack.c.bf16 %v1985_v58, %v1984_v8  ;;  %v2180_v31 = vld [vmem:[%s3718_s24 + $0x50] sm:$0xff] }
 0x931   : > { %2666 = vmatpush3.bf16.msra.mxu0 %v2665_v59 }
 0x932   : > { %2668 = vmatprep.subr.bf16.mxu0 %v2667_v45 }
 0x933   : > { %v1883_v55 = vpop.permute.xlu1 %1882 }
 0x934   : > { %v1888_v56 = vrot.slane %v1883_v55, %v3019_v13  ;;  %v2185_v55 = vld [vmem:[%s3718_s24 + $0x78] sm:$0xff] }
 0x935   : > { %2670 = vmatpush3.bf16.msra.mxu0 %v2669_v32 }
 0x936   : > { %2672 = vmatprep.subr.bf16.mxu0 %v2671_v2 }
 0x939   : > { %2674 = vmatpush3.bf16.msra.mxu0 %v2673_v29 }
 0x93a   : > { %2676 = vmatprep.subr.bf16.mxu0 %v2675_v12 }
 0x93d   : > { %2678 = vmatpush3.bf16.msra.mxu0 %v2677_v16  ;;  %v2173_v16 = vld [vmem:[%s3718_s24 + $0x18] sm:$0xff] }
 0x93e   : > { %2680 = vmatprep.subr.bf16.mxu0 %v2679_v15  ;;  %v2691_v9 = vpack.c.bf16 %v2173_v16, %v2171_v26  ;;  %v2172_v15 = vld [vmem:[%s3718_s24 + $0x10] sm:$0xff] }
 0x93f   : > { %v2693_v21 = vpack.c.bf16 %v2172_v15, %v2170_v5 }
 0x940   : > { %2692 = vmatprep.subr.bf16.mxu1 %v2691_v9  ;;  %v2128_v9 = vstv %s2485_s30 }
 0x941   : > { %2682 = vmatpush3.bf16.msra.mxu0 %v2681_v25  ;;  %2694 = vmatpush1.bf16.msra.mxu1 %v2693_v21  ;;  %v2177_v25 = vld [vmem:[%s3718_s24 + $0x38] sm:$0xff] }
 0x942   : > { %2684 = vmatprep.subr.bf16.mxu0 %v2683_v37  ;;  %v2695_v30 = vpack.c.bf16 %v2177_v25, %v2175_v23  ;;  %v2697_v37 = vpack.c.bf16 %v2176_v35, %v2174_v33 }
 0x944   : > { %2696 = vmatprep.subr.bf16.mxu1 %v2695_v30 }
 0x945   : > { %2686 = vmatpush3.bf16.msra.mxu0 %v2685_v61  ;;  %2698 = vmatpush1.bf16.msra.mxu1 %v2697_v37  ;;  %v2181_v61 = vld [vmem:[%s3718_s24 + $0x58] sm:$0xff] }
 0x946   : > { %2688 = vmatprep.subr.bf16.mxu0 %v2687_v43  ;;  %v2699_v43 = vpack.c.bf16 %v2181_v61, %v2179_v17 }
 0x948   : > { %2700 = vmatprep.subr.bf16.mxu1 %v2699_v43 }
 0x949   : > { %2690 = vmatpush3.bf16.msra.mxu0 %v2689_v47  ;;  %v2701_v47 = vpack.c.bf16 %v2180_v31, %v2178_v22 }
 0x94b   : > { %2702 = vmatpush1.bf16.msra.mxu1 %v2701_v47 }
 0xa00   : > { %v1965_v8 = vpop.f32.mrb[10].mxu1 }
 0xa01   : > { %v1966_v58 = vadd.f32 %v1965_v8, %v1888_v56  ;;  %v1967_v59 = vpop.f32.mrb[11].mxu1  ;;  %v2182_v8 = vld [vmem:[%s3718_s24 + $0x60] sm:$0xff] }
 0xa02   : > { %v1968_v62 = vadd.f32 %v1967_v59, %v1888_v56  ;;  %v2703_v56 = vpack.c.bf16 %v2185_v55, %v2183_v52  ;;  %v2164_v55 = vstv %s2490_s12 }
 0xa03   : > { %v2481_v1 = vmul.f32 -1.442695, %v1966_v58  ;;  %v2184_v58 = vld [vmem:[%s3718_s24 + $0x70] sm:$0xff] }
 0xa04   : > { %v2482_v45 = vmul.f32 -1.442695, %v1968_v62  ;;  %v2705_v59 = vpack.c.bf16 %v2184_v58, %v2182_v8  ;;  %2704 = vmatprep.subr.bf16.mxu1 %v2703_v56 }
 0xa05   : > { %2754 = vpow2.f32 %v2481_v1 }
 0xa06   : > { %2756 = vpow2.f32 %v2482_v45  ;;  %2706 = vmatpush1.bf16.msra.mxu1 %v2705_v59 }
 0xa0f   : > { %v2755_v49 = vpop.eup %2754 }
 0xa10   : > { %v2757_v48 = vpop.eup %2756  ;;  %v1976_v32 = vadd.f32 1.0, %v2755_v49 }
 0xa11   : > { %v1977_v51 = vadd.f32 1.0, %v2757_v48 }
 0xa13   : > { %2758 = vrcp.f32 %v1977_v51  ;;  %v2090_v51 = vstv %s2089_s1 }
 0xa14   : > { %2760 = vrcp.f32 %v1976_v32 }
 0xa1d   : > { %v3548_v34 = vpop.eup %2758 }
 0xa1e   : > { %v3550_v2 = vpop.eup %2760  ;;  %2078 = vmatprep.mubr.f32.mxu0 %v3548_v34 }
 0xa1f   : > { %2079 = vmatmul.mubr.f32.vlgmr.msra.gmra.mrb[4].mxu0 %v3550_v2 }
 0xaf2   : > { %v2556_v4 = vpop.f32.mrb[4].mxu0 }
 0xaf3   : > { %v2557_v20 = vpop.f32.mrb[5].mxu0 }
 0xaf4   : > { %v2558_v29 = vadd.f32 %v2557_v20, %v2556_v4 }
 0xaf6   : > { %v2087_v6 = vrot.slane %v2558_v29, %v3019_v13  ;;  %v2120_v29 = vstv %s2484_s15 }
 0xaf8   : > { %v3556_v7 = vmul.f32 %v2087_v6, %v3110_v10 }
 0xafa   : > { %2093 = vrot.lane.b32.xlu0 %v3556_v7, %s3807_s13 }
 0xb6c   : > { %v2094_v12 = vpop.permute.xlu0 %2093 }
 0xb6d   : > { %v2095_v50 = vsel %vm866_vm0, %v2094_v12, %v3556_v7 }
 0xb6e   : > { %2096 = vrot.lane.b32.xlu1 %v2095_v50, %s3807_s13 }
 0xbe0   : > { %v2097_v39 = vpop.permute.xlu1 %2096 }
 0xbe1   : > { %v2098_v60 = vsel %vm866_vm0, %v2097_v39, %v3556_v7 }
 0xbe2   : > { %2108 = vrot.lane.b32.xlu1 %v2098_v60, %s3788_s18  ;;  %2100 = vrot.lane.b32.xlu0 %v2098_v60, %s3808_s17  ;;  %s855_s17 = scalar_lea.vmem %s3720_s26, %s2983_s5 }
 0xbe6   : > { %2124 = vrot.lane.b32.xlu1 %v2098_v60, %s3791_s0  ;;  %2116 = vrot.lane.b32.xlu0 %v2098_v60, %s3790_s4  ;;  %s2092_s4 = sld [smem:[#allocation5]]  ;;  %s2483_s0 = sld [smem:[#allocation5 + $0x1]] }
 0xbea   : > { %2144 = vrot.lane.b32.xlu1 %v2098_v60, %s3792_s3  ;;  %2136 = vrot.lane.b32.xlu0 %v2098_v60, %s3801_s9  ;;  %s2487_s3 = sld [smem:[#allocation5 + $0x5]] }
 0xbec   : > { %v2104_v1 = vstv %s2092_s4  ;;  %v2112_v32 = vstv %s2483_s0 }
 0xbee   : > { %2160 = vrot.lane.b32.xlu1 %v2098_v60, %s3789_s7  ;;  %2152 = vrot.lane.b32.xlu0 %v2098_v60, %s3793_s28  ;;  %s2488_s28 = sld [smem:[#allocation5 + $0x6]]  ;;  %s2489_s7 = sld [smem:[#allocation5 + $0x7]] }
 0xbf0   : > { %v2140_v33 = vstv %s2487_s3 }
 0xbf4   : > { %v2148_v39 = vstv %s2488_s28  ;;  %v2156_v22 = vstv %s2489_s7 }
 0xc54   : > { %v2109_v62 = vpop.permute.xlu1 %2108  ;;  %v2101_v45 = vpop.permute.xlu0 %2100 }
 0xc55   : > { %v2111_v49 = vmul.f32 %v2109_v62, %v3032_v19  ;;  %v2103_v48 = vmul.f32 %v2101_v45, %v3029_v18  ;;  %v2132_v18 = vstv %s2486_s11 }
 0xc57   : > { %v2105_v4 = vmul.f32 %v2104_v1, %v2103_v48  ;;  %v2113_v12 = vmul.f32 %v2112_v32, %v2111_v49 }
 0xc58   : > { %v2125_v20 = vpop.permute.xlu1 %2124  ;;  %v2117_v6 = vpop.permute.xlu0 %2116 }
 0xc59   : > { %v2106_v50 = vadd.f32 %v2105_v4, %v2090_v51  ;;  %v2127_v26 = vmul.f32 %v2125_v20, %v3044_v27  ;;  %v2119_v16 = vmul.f32 %v2117_v6, %v3039_v24  ;;  %v2133_v27 = vmul.f32 %v2132_v18, %v3556_v7 }
 0xc5a   : > { %v2167_v7 = vrot.slane %v3110_v10, 4  ;;  %v1313_v10 = vld [vmem:[%s3709_s14] sm:$0xff] }
 0xc5b   : > { %v2114_v5 = vadd.f32 %v2113_v12, %v2106_v50  ;;  %v2121_v19 = vmul.f32 %v2120_v29, %v2119_v16  ;;  %v2129_v23 = vmul.f32 %v2128_v9, %v2127_v26 }
 0xc5c   : > { %v2145_v15 = vpop.permute.xlu1 %2144  ;;  %v2137_v21 = vpop.permute.xlu0 %2136 }
 0xc5d   : > { %v2122_v25 = vadd.f32 %v2121_v19, %v2114_v5  ;;  %v2139_v30 = vmul.f32 %v2137_v21, %v3047_v28  ;;  %v2147_v37 = vmul.f32 %v2145_v15, %v3058_v38  ;;  %v2762_v28 = vld [vmem:[%s3778_s20 + $0x8] ss:$0 sm:$0xff] }
 0xc5f   : > { %v2130_v35 = vadd.f32 %v2129_v23, %v2122_v25  ;;  %v2141_v61 = vmul.f32 %v2140_v33, %v2139_v30  ;;  %v2149_v31 = vmul.f32 %v2148_v39, %v2147_v37 }
 0xc60   : > { %v2161_v24 = vpop.permute.xlu1 %2160  ;;  %v2153_v60 = vpop.permute.xlu0 %2152 }
 0xc61   : > { %v2134_v17 = vadd.f32 %v2133_v27, %v2130_v35  ;;  %v2155_v43 = vmul.f32 %v2153_v60, %v3061_v40  ;;  %v2163_v52 = vmul.f32 %v2762_v28, %v2161_v24 }
 0xc63   : > { %v2142_v47 = vadd.f32 %v2141_v61, %v2134_v17  ;;  %v2157_v38 = vmul.f32 %v2156_v22, %v2155_v43  ;;  %v2165_v8 = vmul.f32 %v2164_v55, %v2163_v52  ;;  %v2311_v61 = vrot.slane %v3548_v34, %v3019_v13  ;;  %v2763_v55 = vld [vmem:[%s3130_s22] sm:$0xff]  ;;  %s850_s22 = scalar_lea.vmem %s3719_s25, %s2983_s5 }
 0xc65   : > { %v2150_v56 = vadd.f32 %v2149_v31, %v2142_v47 }
 0xc67   : > { %v2158_v58 = vadd.f32 %v2157_v38, %v2150_v56 }
 0xc69   : > { %v2166_v59 = vadd.f32 %v2165_v8, %v2158_v58 }
 0xc6b   : > { %v2169_v62 = vsel %vm1198_vm5, %v2166_v59, %v2167_v7 }
 0xc6c   : > { %2491 = vmatmul.mubr.msk.f32.vlgmr.msra.gmra.mrb[12].mxu1 %vm1019_vm3, %v2169_v62 }
 0xd3f   : > { %v2255_v40 = vpop.f32.mrb[12].mxu1 }
 0xd40   : > { %v2260_v1 = vmax.f32 %v2255_v40, 0.0  ;;  %v2257_v45 = vpop.f32.mrb[13].mxu1  ;;  %v2316_v57 = vrot.slane %v2255_v40, 4 }
 0xd41   : > { %v2261_v49 = vmax.f32 %v2257_v45, 0.0  ;;  %v2317_v31 = vrot.slane %v2257_v45, 4 }
 0xd42   : > { %2262 = vrot.lane.b32.xlu0 %v2260_v1, %s3797_s8 }
 0xd43   : > { %2264 = vrot.lane.b32.xlu1 %v2261_v49, %s3797_s8 }
 0xd46   : > { %2272 = vrot.lane.b32.xlu0 %v2260_v1, %s3803_s6 }
 0xd47   : > { %2274 = vrot.lane.b32.xlu1 %v2261_v49, %s3803_s6 }
 0xd4a   : > { %1316 = vperm.xlu0 %2747, %v1313_v10  }
 0xdb4   : > { %v2263_v48 = vpop.permute.xlu0 %2262 }
 0xdb5   : > { %v2265_v32 = vpop.permute.xlu1 %2264 }
 0xdb6   : > { %v2266_v51 = vsel %vm1512_vm7, %v2263_v48, %v2265_v32  ;;  %v2267_v4 = vsel %vm1512_vm7, %v2265_v32, %v2263_v48 }
 0xdb7   : > { %v2268_v20 = vmul.f32 %v2267_v4, %v3209_v11  ;;  %v2269_v29 = vmul.f32 %v2266_v51, %v3213_v63  ;;  %v1394_v11 = vld [vmem:[%s3711_s16] sm:$0xff] }
 0xdb8   : > { %v2273_v6 = vpop.permute.xlu0 %2272 }
 0xdb9   : > { %v2275_v12 = vpop.permute.xlu1 %2274  ;;  %v2270_v16 = vadd.f32 %v2268_v20, %v2260_v1  ;;  %v2271_v9 = vadd.f32 %v2269_v29, %v2261_v49 }
 0xdba   : > { %v2276_v50 = vsel %vm1597_vm12, %v2273_v6, %v2275_v12  ;;  %v2277_v26 = vsel %vm1597_vm12, %v2275_v12, %v2273_v6 }
 0xdbb   : > { %v2278_v5 = vmul.f32 %v2276_v50, %v3264_v44  ;;  %v2279_v19 = vmul.f32 %v2277_v26, %v3273_v54 }
 0xdbd   : > { %v2281_v15 = vadd.f32 %v2279_v19, %v2271_v9  ;;  %v2280_v18 = vadd.f32 %v2278_v5, %v2270_v16 }
 0xdbf   : > { %2284 = vrot.lane.b32.xlu0 %v2281_v15, %s3800_s2  ;;  %2282 = vrot.lane.b32.xlu1 %v2280_v18, %s3800_s2 }
 0xdc3   : > { %2294 = vrot.lane.b32.xlu0 %v2281_v15, %s3801_s9  ;;  %2292 = vrot.lane.b32.xlu1 %v2280_v18, %s3801_s9 }
 0xdc7   : > { %1478 = vperm.xlu0 %2747, %v3096_v3   ;;  %1397 = vperm.xlu1 %2748, %v1394_v11  }
 0xdc9   : > { %v1317_v63 = vpop.permute.xlu0 %1316 }
 0xe31   : > { %v2285_v44 = vpop.permute.xlu0 %2284  ;;  %v2283_v54 = vpop.permute.xlu1 %2282 }
 0xe32   : > { %v2286_v21 = vsel %vm1546_vm8, %v2283_v54, %v2285_v44  ;;  %v2287_v23 = vsel %vm1546_vm8, %v2285_v44, %v2283_v54 }
 0xe33   : > { %v2288_v25 = vmul.f32 %v2287_v23, %v3228_v14  ;;  %v2289_v30 = vmul.f32 %v2286_v21, %v3217_v0  ;;  %v2307_v0 = vrot.slane %v3550_v2, %v3019_v13 }
 0xe35   : > { %v2295_v33 = vpop.permute.xlu0 %2294  ;;  %v2293_v35 = vpop.permute.xlu1 %2292  ;;  %v2290_v27 = vadd.f32 %v2288_v25, %v2280_v18  ;;  %v2291_v39 = vadd.f32 %v2289_v30, %v2281_v15 }
 0xe36   : > { %v2296_v37 = vsel %vm1563_vm11, %v2293_v35, %v2295_v33  ;;  %v2297_v3 = vsel %vm1563_vm11, %v2295_v33, %v2293_v35 }
 0xe37   : > { %v2298_v24 = vmul.f32 %v2296_v37, %v3252_v41  ;;  %v2299_v60 = vmul.f32 %v2297_v3, %v3256_v42  ;;  %v1389_v42 = vadd.f32 %v3341_v53, %v1317_v63  ;;  %v2764_v53 = vld [vmem:[%s2989_s27] sm:$0xff] }
 0xe39   : > { %v2300_v17 = vadd.f32 %v2298_v24, %v2290_v27  ;;  %v2301_v14 = vadd.f32 %v2299_v60, %v2291_v39  ;;  %v1392_v34 = vmax.f32 %v1389_v42, 0.0 }
 0xe3b   : > { %v2302_v43 = vmul.f32 0.11111111, %v2300_v17  ;;  %v2303_v22 = vmul.f32 0.11111111, %v2301_v14 }
 0xe3d   : > { %v2312_v47 = vmul.f32 %v2307_v0, %v2302_v43  ;;  %v2313_v28 = vmul.f32 %v2311_v61, %v2303_v22 }
 0xe3f   : > { %v2320_v52 = vadd.f32 %v2316_v57, %v2312_v47  ;;  %v2321_v41 = vadd.f32 %v2317_v31, %v2313_v28 }
 0xe41   : > { %v2322_v56 = vsub.f32 %v2320_v52, %v2763_v55  ;;  %v2323_v38 = vsub.f32 %v2321_v41, %v3152_v36 }
 0xe43   : > { %v2326_v13 = vcombine.low %v2322_v56, %v2323_v38 }
 0xe45   : > { %2328 = vst [vmem:[%s855_s17] sm:$0xff] %v2326_v13 }
 0xe46   : > { %v1479_v2 = vpop.permute.xlu0 %1478  ;;  %v1398_v7 = vpop.permute.xlu1 %1397 }
 0xe47   : > { %v1481_v8 = vmul.f32 %v1479_v2, %v1392_v34  ;;  %v1473_v58 = vadd.f32 %v3545_v46, %v1398_v7 }
 0xe49   : > { %v1482_v59 = vadd.f32 %v1481_v8, %v1473_v58 }
 0xe4b   : > { %v1483_v62 = vsub.f32 %v1482_v59, %v2764_v53 }
 0xe4d   : > { %1484 = vst.msk [vmem:[%s850_s22] sm:$0xff] %vm1019_vm3, %v1483_v62 }
 0xe4e PF: > { %s43_s29 = sadd.s32 1, %s2790_s29  }
 0xe4f   : > { %p40_p1 = scmp.ge.s32.totalorder %s43_s29, 4  }
 0xe51   :  { %42 = sbr.rel (!%p40_p1) target bundleno = 21 (0x15), region = 173 }
 0xe58   :  { %2364 = vsyncpa [#allocation6], 1 }
 0xe59   :  { %2366 = vsyncpa [#allocation6 + $0x1], 1 }

</bundles_post_ra>
